<compile_context>
chip_gen: v7x
topology: tpu7x:2x2x1
jax: 0.10.0
libtpu: 0.0.40
codegen_flags: <defaults>
</compile_context>

<pallas_src>
import numpy as np
import jax
import jax.numpy as jnp
from jax import lax
from jax.experimental import pallas as pl
from jax.experimental.pallas import tpu as pltpu


def _bigru_chunk_kernel(len_ref, xpf_ref, xpb_ref, whf_ref, whb_ref,
                        bhf_ref, bhb_ref, outf_ref, outb_ref, hsum_ref,
                        hf_ref, hb_ref):
    """One time-chunk of the bidirectional GRU recurrence.

    grid = (num_batch_blocks, num_time_chunks); the time axis is "arbitrary"
    (sequential) and the running hidden states are carried across chunks in
    VMEM scratch.

    len_ref  : (bt, 1)      int32  sequence lengths for this batch tile
    xpf_ref  : (Tc, bt, 3H) bf16   x @ W_ih_fwd + biases, gate order [r|z|n]
    xpb_ref  : (Tc, bt, 3H) bf16   x @ W_ih_bwd + biases (reversed chunk order)
    whf/whb  : (H, 3H)      bf16   fused hidden weights
    bhf/bhb  : (1, 3H)      f32    [0 | 0 | b_hn]
    outf_ref : (Tc, bt, H)  f32    forward-direction outputs (time-major)
    outb_ref : (Tc, bt, H)  f32    backward-direction outputs (time-major)
    hsum_ref : (bt, H)      f32    final fwd + bwd hidden (written on last chunk)
    hf_ref/hb_ref : (bt, H) f32    VMEM carry of the running hidden states
    """
    c = pl.program_id(1)
    nc = pl.num_programs(1)
    Tc = xpf_ref.shape[0]
    bt, H = hsum_ref.shape
    G2 = 2 * H

    @pl.when(c == 0)
    def _():
        hf_ref[...] = jnp.zeros_like(hf_ref)
        hb_ref[...] = jnp.zeros_like(hb_ref)

    # Hoist weight / bias / length loads (and the bias broadcast) out of the loop.
    whf = whf_ref[...]
    whb = whb_ref[...]
    bhf = jnp.broadcast_to(bhf_ref[...], (bt, 3 * H))
    bhb = jnp.broadcast_to(bhb_ref[...], (bt, 3 * H))
    lens = len_ref[...]                                   # (bt, 1) int32

    t0_f = c * Tc                                         # global start, fwd chunk
    t0_b = (nc - 1 - c) * Tc                              # global start, bwd chunk

    def gru_step(xp_b16, h, whh, bh):
        # xp contains [x@W_ir+b_ir+b_hr | x@W_iz+b_iz+b_hz | x@W_in+b_in]
        # hp contains [h@W_hr           | h@W_hz           | h@W_hn+b_hn ]
        xp = xp_b16.astype(jnp.float32)
        hp = jnp.dot(h.astype(whh.dtype), whh,
                     preferred_element_type=jnp.float32) + bh          # (bt, 3H)
        rz = jax.nn.sigmoid(xp[:, :G2] + hp[:, :G2])                    # r|z fused
        r = rz[:, :H]
        z = rz[:, H:]
        n = jnp.tanh(xp[:, G2:] + r * hp[:, G2:])
        return (1.0 - z) * n + z * h

    def body(i, carry):
        h_f, h_b = carry
        li_f = i                       # local fwd index within chunk
        li_b = Tc - 1 - i              # local bwd index within (reversed) chunk
        tf = t0_f + li_f               # global time index, fwd
        tb = t0_b + li_b               # global time index, bwd

        m_f = (tf < lens).astype(jnp.float32)             # (bt, 1)
        m_b = (tb < lens).astype(jnp.float32)

        hn_f = gru_step(xpf_ref[li_f], h_f, whf, bhf)
        hn_b = gru_step(xpb_ref[li_b], h_b, whb, bhb)

        # Each (direction, time) element is written exactly once: plain
        # overwrite -> no zero-init and no read-modify-write accumulation.
        outf_ref[li_f] = m_f * hn_f
        outb_ref[li_b] = m_b * hn_b

        # Freeze hidden past each sequence's end (packed-sequence semantics).
        h_f = m_f * hn_f + (1.0 - m_f) * h_f
        h_b = m_b * hn_b + (1.0 - m_b) * h_b
        return (h_f, h_b)

    h_f, h_b = lax.fori_loop(0, Tc, body, (hf_ref[...], hb_ref[...]),
                             unroll=min(4, Tc))
    hf_ref[...] = h_f
    hb_ref[...] = h_b

    @pl.when(c == nc - 1)
    def _():
        hsum_ref[...] = h_f + h_b


def _pick_time_block(T, bt, H, time_block):
    """Largest divisor of T whose streaming blocks fit a modest VMEM budget."""
    if time_block is not None:
        cap = max(1, min(int(time_block), T))
    else:
        budget = 12 * 1024 * 1024                      # streaming-block budget
        per_step = bt * (2 * 3 * H * 2 + 2 * H * 4)    # xp_f+xp_b bf16, out_f+out_b f32
        cap = max(1, budget // (2 * per_step))         # x2: double buffering
    tc = 1
    for d in range(1, T + 1):
        if T % d == 0 and d <= cap:
            tc = d
    return tc


def _vmem_limit_bytes(tc, bt, H):
    G = 3 * H
    stream = 2 * (2 * tc * bt * G * 2 + 2 * tc * bt * H * 4)   # double-buffered xp + out
    weights = 2 * (2 * H * G * 2 + 2 * G * 4)                  # W_hh + biases, both dirs
    misc = 4 * (bt * H * 4) + 2 * bt * 4                       # hsum + h scratch + lens
    need = stream + weights + misc + (4 << 20)                 # headroom
    # Cap below v7x's 64 MiB physical VMEM per TensorCore.
    return int(min(max(need, 16 << 20), 48 << 20))


def encoder_rnn_forward(params, input_seqs, input_lengths, *,
                        batch_block=None, time_block=None):
    """Mirrors EncoderRNN.forward(data, input_seqs, input_lengths).

    input_seqs    : (T, B) int32 token ids (time-major)
    input_lengths : (B,)   int32 (descending, as pack_padded_sequence requires)
    returns (outputs (B, T, H), hidden (1, B, H))
    """
    T, B = input_seqs.shape
    emb_table = params["embedding"]
    H = params["whh_f"].shape[0]
    G = 3 * H
    # The original module feeds the embedding straight into a GRU whose input
    # size is hidden_size, so emb_dim must equal hidden_size.
    assert emb_table.shape[1] == H, "EncoderRNN requires emb_dim == hidden_size"

    # Embedding lookup; dropout_layer is identity at inference.
    # TODO(synk): training-mode dropout not implemented (inference semantics).
    embedded = emb_table[input_seqs]                       # (T, B, H) f32
    emb_b16 = embedded.astype(jnp.bfloat16)

    wih_f = params["wih_f"].astype(jnp.bfloat16)           # (H, 3H)
    wih_b = params["wih_b"].astype(jnp.bfloat16)
    whh_f = params["whh_f"].astype(jnp.bfloat16)
    whh_b = params["whh_b"].astype(jnp.bfloat16)

    # ONE fused input projection for both directions (single pass over the
    # embeddings), biases folded in f32, then stored bf16 for the kernel.
    wih_cat = jnp.concatenate([wih_f, wih_b], axis=1)      # (H, 6H)
    xp = jnp.einsum("tbh,hg->tbg", emb_b16, wih_cat,
                    preferred_element_type=jnp.float32)     # (T, B, 6H) f32
    xp_f = (xp[..., :G] + params["bx_f"]).astype(jnp.bfloat16)
    xp_b = (xp[..., G:] + params["bx_b"]).astype(jnp.bfloat16)

    lens2d = input_lengths.astype(jnp.int32).reshape(B, 1)

    # Batch tiling (parallel grid axis).  For v7x pass batch_block (multiple
    # of 16) so the batch axis has >= 2 grid points (2 TensorCores per chip);
    # otherwise the whole batch is one tile.
    if batch_block is not None and batch_block % 16 == 0 and batch_block < B:
        bt = int(batch_block)
        B_pad = ((B + bt - 1) // bt) * bt
    else:
        bt = B
        B_pad = B
    if B_pad != B:
        pad = B_pad - B
        xp_f = jnp.pad(xp_f, ((0, 0), (0, pad), (0, 0)))
        xp_b = jnp.pad(xp_b, ((0, 0), (0, pad), (0, 0)))
        lens2d = jnp.pad(lens2d, ((0, pad), (0, 0)))       # len 0 -> fully masked

    # Time chunking ("arbitrary" grid axis): VMEM scales with Tc, not T.
    tc = _pick_time_block(T, bt, H, time_block)
    num_c = T // tc
    num_b = B_pad // bt

    out_f, out_b, hsum = pl.pallas_call(
        _bigru_chunk_kernel,
        grid=(num_b, num_c),
        out_shape=(jax.ShapeDtypeStruct((T, B_pad, H), jnp.float32),
                   jax.ShapeDtypeStruct((T, B_pad, H), jnp.float32),
                   jax.ShapeDtypeStruct((B_pad, H), jnp.float32)),
        in_specs=[
            pl.BlockSpec((bt, 1), lambda b, c: (b, 0)),                     # lengths
            pl.BlockSpec((tc, bt, G), lambda b, c: (c, b, 0)),              # xp fwd
            pl.BlockSpec((tc, bt, G), lambda b, c: (num_c - 1 - c, b, 0)),  # xp bwd (reversed)
            pl.BlockSpec((H, G), lambda b, c: (0, 0)),                      # W_hh fwd
            pl.BlockSpec((H, G), lambda b, c: (0, 0)),                      # W_hh bwd
            pl.BlockSpec((1, G), lambda b, c: (0, 0)),                      # b_hn fwd
            pl.BlockSpec((1, G), lambda b, c: (0, 0)),                      # b_hn bwd
        ],
        out_specs=(
            pl.BlockSpec((tc, bt, H), lambda b, c: (c, b, 0)),              # fwd outputs
            pl.BlockSpec((tc, bt, H), lambda b, c: (num_c - 1 - c, b, 0)),  # bwd outputs
            pl.BlockSpec((bt, H), lambda b, c: (b, 0)),                     # summed hidden
        ),
        scratch_shapes=[pltpu.VMEM((bt, H), jnp.float32),    # h_f carry across chunks
                        pltpu.VMEM((bt, H), jnp.float32)],   # h_b carry across chunks
        compiler_params=pltpu.CompilerParams(
            dimension_semantics=("parallel", "arbitrary"),
            vmem_limit_bytes=_vmem_limit_bytes(tc, bt, H)),
    )(lens2d, xp_f, xp_b, whh_f, whh_b, params["bh_f"], params["bh_b"])

    # Single XLA pass: sum the two directions and move to batch-major.
    outputs = jnp.swapaxes(out_f + out_b, 0, 1)[:B]         # (B, T, H)
    hidden = hsum[None, :B, :]                              # (1, B, H)
    return outputs, hidden


def make_params(key, vocab_size, hidden_size, pad_index=0):
    """Deterministic synthetic parameters matching the module's shapes.

    Weights are packed for the fused-gate formulation:
      wih_* : (H, 3H)  transposed input weights, gate order [r|z|n]
      whh_* : (H, 3H)  transposed hidden weights, gate order [r|z|n]
      bx_*  : (3H,)    [b_ir+b_hr | b_iz+b_hz | b_in]   (folded into x-proj)
      bh_*  : (1, 3H)  [0 | 0 | b_hn]                   (added to h-proj)
    """
    H = hidden_size
    keys = jax.random.split(key, 3)

    # nn.Embedding(vocab, H), weight ~ N(0, 0.1), padding row zeroed.
    # TODO(synk): args['load_embedding'] (embedding JSON from disk) not translatable.
    emb = 0.1 * jax.random.normal(keys[0], (vocab_size, H), jnp.float32)
    emb = emb.at[pad_index].set(0.0)

    # PyTorch GRU default init: U(-1/sqrt(H), 1/sqrt(H)); gate order [r, z, n].
    s = 1.0 / np.sqrt(H)

    def direction(k):
        k = jax.random.split(k, 4)
        u = lambda kk, shape: jax.random.uniform(kk, shape, jnp.float32, -s, s)
        w_ih = u(k[0], (3, H, H))
        w_hh = u(k[1], (3, H, H))
        b_ih = u(k[2], (3, H))
        b_hh = u(k[3], (3, H))
        wih = jnp.concatenate([w_ih[0].T, w_ih[1].T, w_ih[2].T], axis=1)   # (H,3H)
        whh = jnp.concatenate([w_hh[0].T, w_hh[1].T, w_hh[2].T], axis=1)   # (H,3H)
        bx = jnp.concatenate([b_ih[0] + b_hh[0], b_ih[1] + b_hh[1], b_ih[2]])
        bh = jnp.concatenate([jnp.zeros((2 * H,), jnp.float32), b_hh[2]])[None, :]
        return wih, whh, bx, bh

    wih_f, whh_f, bx_f, bh_f = direction(keys[1])
    wih_b, whh_b, bx_b, bh_b = direction(keys[2])

    return {"embedding": emb,
            "wih_f": wih_f, "whh_f": whh_f, "bx_f": bx_f, "bh_f": bh_f,
            "wih_b": wih_b, "whh_b": whh_b, "bx_b": bx_b, "bh_b": bh_b}


def _reference_forward(params, input_seqs, input_lengths):
    """Plain numpy reference of the same math (same bf16 rounding chain)."""
    T, B = input_seqs.shape
    H = params["whh_f"].shape[0]

    def bf16(x):
        return np.asarray(jnp.asarray(x).astype(jnp.bfloat16).astype(jnp.float32))

    p = {k: np.asarray(v) for k, v in params.items()}
    emb_tab = bf16(p["embedding"])
    emb = emb_tab[np.asarray(input_seqs)]                   # (T, B, H)
    lens = np.asarray(input_lengths)

    wih_f = bf16(p["wih_f"]); whh_f = bf16(p["whh_f"])
    wih_b = bf16(p["wih_b"]); whh_b = bf16(p["whh_b"])

    xp_f = bf16(emb @ wih_f + p["bx_f"])                    # (T, B, 3H) "bf16"
    xp_b = bf16(emb @ wih_b + p["bx_b"])

    def step(xp, h, whh, bh):
        hp = bf16(h) @ whh + bh
        rz = 1.0 / (1.0 + np.exp(-(xp[:, :2 * H] + hp[:, :2 * H])))
        r, z = rz[:, :H], rz[:, H:]
        n = np.tanh(xp[:, 2 * H:] + r * hp[:, 2 * H:])
        return (1.0 - z) * n + z * h

    out = np.zeros((T, B, H), np.float32)
    h = np.zeros((B, H), np.float32)
    for t in range(T):
        m = (t < lens).astype(np.float32)[:, None]
        hn = step(xp_f[t], h, whh_f, p["bh_f"])
        h = m * hn + (1.0 - m) * h
        out[t] += m * hn
    hsum = h.copy()

    h = np.zeros((B, H), np.float32)
    for t in range(T - 1, -1, -1):
        m = (t < lens).astype(np.float32)[:, None]
        hn = step(xp_b[t], h, whh_b, p["bh_b"])
        h = m * hn + (1.0 - m) * h
        out[t] += m * hn
    hsum += h
    return out.transpose(1, 0, 2), hsum[None]


if __name__ == "__main__":
    T, B, H, V = 8, 2, 32, 50   # seq_len, batch, hidden_size (= emb dim), vocab

    key = jax.random.PRNGKey(0)
    params = make_params(key, V, H, pad_index=0)

    # Deterministic token ids (time-major) and descending lengths; pad tail with 0.
    k_ids = jax.random.split(key, 2)[1]
    input_lengths = jnp.array([8, 6], dtype=jnp.int32)
    ids = jax.random.randint(k_ids, (T, B), 1, V, dtype=jnp.int32)
    t_idx = jnp.arange(T, dtype=jnp.int32)[:, None]
    input_seqs = jnp.where(t_idx < input_lengths[None, :], ids, 0)

    # time_block=4 exercises the multi-chunk (time-grid) recurrence path.
    outputs, hidden = encoder_rnn_forward(params, input_seqs, input_lengths,
                                          time_block=4)
    outputs = jax.block_until_ready(outputs)
    hidden = jax.block_until_ready(hidden)

    assert outputs.shape == (B, T, H) and hidden.shape == (1, B, H)

    ref_out, ref_hid = _reference_forward(params, input_seqs, input_lengths)
    # Tolerance covers bf16 MXU inputs / bf16-stored projections (gate math f32).
    np.testing.assert_allclose(np.asarray(outputs), ref_out, atol=2e-2, rtol=2e-2)
    np.testing.assert_allclose(np.asarray(hidden), ref_hid, atol=2e-2, rtol=2e-2)

    print("KERNEL_OK")
</pallas_src>

<mosaic_0001>
module attributes {stable_mosaic.version = 11 : i64} {
  func.func @_bigru_chunk_kernel(%arg0: i32, %arg1: i32, %arg2: memref<2x1xi32, #tpu.memory_space<vmem>>, %arg3: memref<4x2x96xbf16, #tpu.memory_space<vmem>>, %arg4: memref<4x2x96xbf16, #tpu.memory_space<vmem>>, %arg5: memref<32x96xbf16, #tpu.memory_space<vmem>>, %arg6: memref<32x96xbf16, #tpu.memory_space<vmem>>, %arg7: memref<1x96xf32, #tpu.memory_space<vmem>>, %arg8: memref<1x96xf32, #tpu.memory_space<vmem>>, %arg9: memref<4x2x32xf32, #tpu.memory_space<vmem>>, %arg10: memref<4x2x32xf32, #tpu.memory_space<vmem>>, %arg11: memref<2x32xf32, #tpu.memory_space<vmem>>, %arg12: memref<2x32xf32, #tpu.memory_space<vmem>>, %arg13: memref<2x32xf32, #tpu.memory_space<vmem>>) attributes {dimension_semantics = [#tpu.dimension_semantics<parallel>, #tpu.dimension_semantics<arbitrary>], iteration_bounds = array<i64: 1, 2>, scalar_prefetch = 0 : i64, scratch_operands = 2 : i64, tpu.core_type = #tpu.core_type<tc>, window_params = [{transform_indices = @transform_0, window_bounds = array<i64: 2, 1>}, {transform_indices = @transform_1, window_bounds = array<i64: 4, 2, 96>}, {transform_indices = @transform_2, window_bounds = array<i64: 4, 2, 96>}, {pipeline_mode = #tpu.pipeline_mode<synchronous>, transform_indices = @transform_3, window_bounds = array<i64: 32, 96>}, {pipeline_mode = #tpu.pipeline_mode<synchronous>, transform_indices = @transform_4, window_bounds = array<i64: 32, 96>}, {pipeline_mode = #tpu.pipeline_mode<synchronous>, transform_indices = @transform_5, window_bounds = array<i64: 1, 96>}, {pipeline_mode = #tpu.pipeline_mode<synchronous>, transform_indices = @transform_6, window_bounds = array<i64: 1, 96>}, {transform_indices = @transform_7, window_bounds = array<i64: 4, 2, 32>}, {transform_indices = @transform_8, window_bounds = array<i64: 4, 2, 32>}, {transform_indices = @transform_9, window_bounds = array<i64: 2, 32>}]} {
    %c0_i32 = arith.constant 0 : i32
    %0 = arith.cmpi eq, %arg1, %c0_i32 : i32
    %1 = arith.extui %0 : i1 to i32
    %c0_i32_0 = arith.constant 0 : i32
    %2 = arith.cmpi ne, %1, %c0_i32_0 : i32
    scf.if %2 {
      %cst_91 = arith.constant 0.000000e+00 : f32
      %386 = vector.broadcast %cst_91 : f32 to vector<2x32xf32>
      %c0_92 = arith.constant 0 : index
      %c0_93 = arith.constant 0 : index
      %387 = vector.load %arg12[%c0_92, %c0_93] : memref<2x32xf32, #tpu.memory_space<vmem>>, vector<2x32xf32>
      tpu.vector_store %arg12[%c0_92, %c0_93], %386 {strides = array<i32>} : memref<2x32xf32, #tpu.memory_space<vmem>>, vector<2x32xf32>,
      %cst_94 = arith.constant 0.000000e+00 : f32
      %388 = vector.broadcast %cst_94 : f32 to vector<2x32xf32>
      %c0_95 = arith.constant 0 : index
      %c0_96 = arith.constant 0 : index
      %389 = vector.load %arg13[%c0_95, %c0_96] : memref<2x32xf32, #tpu.memory_space<vmem>>, vector<2x32xf32>
      tpu.vector_store %arg13[%c0_95, %c0_96], %388 {strides = array<i32>} : memref<2x32xf32, #tpu.memory_space<vmem>>, vector<2x32xf32>,
    } else {
    }
    %c0 = arith.constant 0 : index
    %c0_1 = arith.constant 0 : index
    %3 = vector.load %arg5[%c0, %c0_1] : memref<32x96xbf16, #tpu.memory_space<vmem>>, vector<32x96xbf16>
    %c0_2 = arith.constant 0 : index
    %c0_3 = arith.constant 0 : index
    %4 = vector.load %arg6[%c0_2, %c0_3] : memref<32x96xbf16, #tpu.memory_space<vmem>>, vector<32x96xbf16>
    %c0_4 = arith.constant 0 : index
    %c0_5 = arith.constant 0 : index
    %5 = vector.load %arg7[%c0_4, %c0_5] : memref<1x96xf32, #tpu.memory_space<vmem>>, vector<1x96xf32>
    %6 = vector.shape_cast %5 : vector<1x96xf32> to vector<1x96xf32>
    %7 = vector.broadcast %6 : vector<1x96xf32> to vector<2x96xf32>
    %c0_6 = arith.constant 0 : index
    %c0_7 = arith.constant 0 : index
    %8 = vector.load %arg8[%c0_6, %c0_7] : memref<1x96xf32, #tpu.memory_space<vmem>>, vector<1x96xf32>
    %9 = vector.shape_cast %8 : vector<1x96xf32> to vector<1x96xf32>
    %10 = vector.broadcast %9 : vector<1x96xf32> to vector<2x96xf32>
    %c0_8 = arith.constant 0 : index
    %c0_9 = arith.constant 0 : index
    %11 = vector.load %arg2[%c0_8, %c0_9] : memref<2x1xi32, #tpu.memory_space<vmem>>, vector<2x1xi32>
    %c4_i32 = arith.constant 4 : i32
    %12 = arith.muli %arg1, %c4_i32 : i32
    %c1_i32 = arith.constant 1 : i32
    %13 = arith.subi %c1_i32, %arg1 : i32
    %c4_i32_10 = arith.constant 4 : i32
    %14 = arith.muli %13, %c4_i32_10 : i32
    %c0_11 = arith.constant 0 : index
    %c0_12 = arith.constant 0 : index
    %15 = vector.load %arg12[%c0_11, %c0_12] : memref<2x32xf32, #tpu.memory_space<vmem>>, vector<2x32xf32>
    %c0_13 = arith.constant 0 : index
    %c0_14 = arith.constant 0 : index
    %16 = vector.load %arg13[%c0_13, %c0_14] : memref<2x32xf32, #tpu.memory_space<vmem>>, vector<2x32xf32>
    %c0_i32_15 = arith.constant 0 : i32
    %c3_i32 = arith.constant 3 : i32
    %17 = arith.subi %c3_i32, %c0_i32_15 : i32
    %18 = arith.addi %12, %c0_i32_15 : i32
    %19 = arith.addi %14, %17 : i32
    %20 = vector.broadcast %18 : i32 to vector<2x1xi32>
    %21 = arith.cmpi slt, %20, %11 : vector<2x1xi32>
    %22 = arith.extui %21 : vector<2x1xi1> to vector<2x1xi32>
    %23 = arith.sitofp %22 : vector<2x1xi32> to vector<2x1xf32>
    %24 = vector.broadcast %19 : i32 to vector<2x1xi32>
    %25 = arith.cmpi slt, %24, %11 : vector<2x1xi32>
    %26 = arith.extui %25 : vector<2x1xi1> to vector<2x1xi32>
    %27 = arith.sitofp %26 : vector<2x1xi32> to vector<2x1xf32>
    %28 = arith.index_cast %c0_i32_15 : i32 to index
    %c0_16 = arith.constant 0 : index
    %c0_17 = arith.constant 0 : index
    %29 = vector.load %arg3[%28, %c0_16, %c0_17] : memref<4x2x96xbf16, #tpu.memory_space<vmem>>, vector<1x2x96xbf16>
    %30 = vector.shape_cast %29 : vector<1x2x96xbf16> to vector<2x96xbf16>
    %31 = arith.extf %30 : vector<2x96xbf16> to vector<2x96xf32>
    %32 = arith.truncf %15 : vector<2x32xf32> to vector<2x32xbf16>
    %cst = arith.constant dense<0.000000e+00> : vector<2x96xf32>
    %33 = tpu.matmul %32, %3, %cst {dimension_numbers = #tpu.dot_dimension_numbers<[1], [0], [0], [1], [0, 0, 1, 1], [], []>} : vector<2x32xbf16>, vector<32x96xbf16>, vector<2x96xf32> -> vector<2x96xf32>
    %34 = arith.addf %33, %7 : vector<2x96xf32>
    %35 = vector.extract_strided_slice %31 {offsets = [0, 0], sizes = [2, 64], strides = [1, 1]} : vector<2x96xf32> to vector<2x64xf32>
    %36 = vector.extract_strided_slice %34 {offsets = [0, 0], sizes = [2, 64], strides = [1, 1]} : vector<2x96xf32> to vector<2x64xf32>
    %37 = arith.addf %35, %36 : vector<2x64xf32>
    %38 = arith.negf %37 : vector<2x64xf32>
    %39 = math.exp %38 : vector<2x64xf32>
    %cst_18 = arith.constant 1.000000e+00 : f32
    %40 = vector.broadcast %cst_18 : f32 to vector<2x64xf32>
    %41 = arith.addf %40, %39 : vector<2x64xf32>
    %42 = arith.divf %40, %41 : vector<2x64xf32>
    %43 = vector.extract_strided_slice %42 {offsets = [0, 0], sizes = [2, 32], strides = [1, 1]} : vector<2x64xf32> to vector<2x32xf32>
    %44 = vector.extract_strided_slice %42 {offsets = [0, 32], sizes = [2, 32], strides = [1, 1]} : vector<2x64xf32> to vector<2x32xf32>
    %45 = vector.extract_strided_slice %31 {offsets = [0, 64], sizes = [2, 32], strides = [1, 1]} : vector<2x96xf32> to vector<2x32xf32>
    %46 = vector.extract_strided_slice %34 {offsets = [0, 64], sizes = [2, 32], strides = [1, 1]} : vector<2x96xf32> to vector<2x32xf32>
    %47 = arith.mulf %43, %46 : vector<2x32xf32>
    %48 = arith.addf %45, %47 : vector<2x32xf32>
    %49 = math.tanh %48 : vector<2x32xf32>
    %cst_19 = arith.constant 1.000000e+00 : f32
    %50 = vector.broadcast %cst_19 : f32 to vector<2x32xf32>
    %51 = arith.subf %50, %44 : vector<2x32xf32>
    %52 = arith.mulf %51, %49 : vector<2x32xf32>
    %53 = arith.mulf %44, %15 : vector<2x32xf32>
    %54 = arith.addf %52, %53 : vector<2x32xf32>
    %55 = arith.index_cast %17 : i32 to index
    %c0_20 = arith.constant 0 : index
    %c0_21 = arith.constant 0 : index
    %56 = vector.load %arg4[%55, %c0_20, %c0_21] : memref<4x2x96xbf16, #tpu.memory_space<vmem>>, vector<1x2x96xbf16>
    %57 = vector.shape_cast %56 : vector<1x2x96xbf16> to vector<2x96xbf16>
    %58 = arith.extf %57 : vector<2x96xbf16> to vector<2x96xf32>
    %59 = arith.truncf %16 : vector<2x32xf32> to vector<2x32xbf16>
    %cst_22 = arith.constant dense<0.000000e+00> : vector<2x96xf32>
    %60 = tpu.matmul %59, %4, %cst_22 {dimension_numbers = #tpu.dot_dimension_numbers<[1], [0], [0], [1], [0, 0, 1, 1], [], []>} : vector<2x32xbf16>, vector<32x96xbf16>, vector<2x96xf32> -> vector<2x96xf32>
    %61 = arith.addf %60, %10 : vector<2x96xf32>
    %62 = vector.extract_strided_slice %58 {offsets = [0, 0], sizes = [2, 64], strides = [1, 1]} : vector<2x96xf32> to vector<2x64xf32>
    %63 = vector.extract_strided_slice %61 {offsets = [0, 0], sizes = [2, 64], strides = [1, 1]} : vector<2x96xf32> to vector<2x64xf32>
    %64 = arith.addf %62, %63 : vector<2x64xf32>
    %65 = arith.negf %64 : vector<2x64xf32>
    %66 = math.exp %65 : vector<2x64xf32>
    %cst_23 = arith.constant 1.000000e+00 : f32
    %67 = vector.broadcast %cst_23 : f32 to vector<2x64xf32>
    %68 = arith.addf %67, %66 : vector<2x64xf32>
    %69 = arith.divf %67, %68 : vector<2x64xf32>
    %70 = vector.extract_strided_slice %69 {offsets = [0, 0], sizes = [2, 32], strides = [1, 1]} : vector<2x64xf32> to vector<2x32xf32>
    %71 = vector.extract_strided_slice %69 {offsets = [0, 32], sizes = [2, 32], strides = [1, 1]} : vector<2x64xf32> to vector<2x32xf32>
    %72 = vector.extract_strided_slice %58 {offsets = [0, 64], sizes = [2, 32], strides = [1, 1]} : vector<2x96xf32> to vector<2x32xf32>
    %73 = vector.extract_strided_slice %61 {offsets = [0, 64], sizes = [2, 32], strides = [1, 1]} : vector<2x96xf32> to vector<2x32xf32>
    %74 = arith.mulf %70, %73 : vector<2x32xf32>
    %75 = arith.addf %72, %74 : vector<2x32xf32>
    %76 = math.tanh %75 : vector<2x32xf32>
    %cst_24 = arith.constant 1.000000e+00 : f32
    %77 = vector.broadcast %cst_24 : f32 to vector<2x32xf32>
    %78 = arith.subf %77, %71 : vector<2x32xf32>
    %79 = arith.mulf %78, %76 : vector<2x32xf32>
    %80 = arith.mulf %71, %16 : vector<2x32xf32>
    %81 = arith.addf %79, %80 : vector<2x32xf32>
    %82 = vector.broadcast %23 : vector<2x1xf32> to vector<2x32xf32>
    %83 = arith.mulf %82, %54 : vector<2x32xf32>
    %84 = arith.index_cast %c0_i32_15 : i32 to index
    %c0_25 = arith.constant 0 : index
    %c0_26 = arith.constant 0 : index
    %85 = vector.load %arg9[%84, %c0_25, %c0_26] : memref<4x2x32xf32, #tpu.memory_space<vmem>>, vector<1x2x32xf32>
    %86 = vector.shape_cast %85 : vector<1x2x32xf32> to vector<2x32xf32>
    %87 = vector.shape_cast %83 : vector<2x32xf32> to vector<1x2x32xf32>
    tpu.vector_store %arg9[%84, %c0_25, %c0_26], %87 {strides = array<i32>} : memref<4x2x32xf32, #tpu.memory_space<vmem>>, vector<1x2x32xf32>,
    %88 = vector.broadcast %27 : vector<2x1xf32> to vector<2x32xf32>
    %89 = arith.mulf %88, %81 : vector<2x32xf32>
    %90 = arith.index_cast %17 : i32 to index
    %c0_27 = arith.constant 0 : index
    %c0_28 = arith.constant 0 : index
    %91 = vector.load %arg10[%90, %c0_27, %c0_28] : memref<4x2x32xf32, #tpu.memory_space<vmem>>, vector<1x2x32xf32>
    %92 = vector.shape_cast %91 : vector<1x2x32xf32> to vector<2x32xf32>
    %93 = vector.shape_cast %89 : vector<2x32xf32> to vector<1x2x32xf32>
    tpu.vector_store %arg10[%90, %c0_27, %c0_28], %93 {strides = array<i32>} : memref<4x2x32xf32, #tpu.memory_space<vmem>>, vector<1x2x32xf32>,
    %94 = vector.broadcast %23 : vector<2x1xf32> to vector<2x32xf32>
    %95 = arith.mulf %94, %54 : vector<2x32xf32>
    %cst_29 = arith.constant 1.000000e+00 : f32
    %96 = vector.broadcast %cst_29 : f32 to vector<2x1xf32>
    %97 = arith.subf %96, %23 : vector<2x1xf32>
    %98 = vector.broadcast %97 : vector<2x1xf32> to vector<2x32xf32>
    %99 = arith.mulf %98, %15 : vector<2x32xf32>
    %100 = arith.addf %95, %99 : vector<2x32xf32>
    %101 = vector.broadcast %27 : vector<2x1xf32> to vector<2x32xf32>
    %102 = arith.mulf %101, %81 : vector<2x32xf32>
    %cst_30 = arith.constant 1.000000e+00 : f32
    %103 = vector.broadcast %cst_30 : f32 to vector<2x1xf32>
    %104 = arith.subf %103, %27 : vector<2x1xf32>
    %105 = vector.broadcast %104 : vector<2x1xf32> to vector<2x32xf32>
    %106 = arith.mulf %105, %16 : vector<2x32xf32>
    %107 = arith.addf %102, %106 : vector<2x32xf32>
    %c1_i32_31 = arith.constant 1 : i32
    %c3_i32_32 = arith.constant 3 : i32
    %108 = arith.subi %c3_i32_32, %c1_i32_31 : i32
    %109 = arith.addi %12, %c1_i32_31 : i32
    %110 = arith.addi %14, %108 : i32
    %111 = vector.broadcast %109 : i32 to vector<2x1xi32>
    %112 = arith.cmpi slt, %111, %11 : vector<2x1xi32>
    %113 = arith.extui %112 : vector<2x1xi1> to vector<2x1xi32>
    %114 = arith.sitofp %113 : vector<2x1xi32> to vector<2x1xf32>
    %115 = vector.broadcast %110 : i32 to vector<2x1xi32>
    %116 = arith.cmpi slt, %115, %11 : vector<2x1xi32>
    %117 = arith.extui %116 : vector<2x1xi1> to vector<2x1xi32>
    %118 = arith.sitofp %117 : vector<2x1xi32> to vector<2x1xf32>
    %119 = arith.index_cast %c1_i32_31 : i32 to index
    %c0_33 = arith.constant 0 : index
    %c0_34 = arith.constant 0 : index
    %120 = vector.load %arg3[%119, %c0_33, %c0_34] : memref<4x2x96xbf16, #tpu.memory_space<vmem>>, vector<1x2x96xbf16>
    %121 = vector.shape_cast %120 : vector<1x2x96xbf16> to vector<2x96xbf16>
    %122 = arith.extf %121 : vector<2x96xbf16> to vector<2x96xf32>
    %123 = arith.truncf %100 : vector<2x32xf32> to vector<2x32xbf16>
    %cst_35 = arith.constant dense<0.000000e+00> : vector<2x96xf32>
    %124 = tpu.matmul %123, %3, %cst_35 {dimension_numbers = #tpu.dot_dimension_numbers<[1], [0], [0], [1], [0, 0, 1, 1], [], []>} : vector<2x32xbf16>, vector<32x96xbf16>, vector<2x96xf32> -> vector<2x96xf32>
    %125 = arith.addf %124, %7 : vector<2x96xf32>
    %126 = vector.extract_strided_slice %122 {offsets = [0, 0], sizes = [2, 64], strides = [1, 1]} : vector<2x96xf32> to vector<2x64xf32>
    %127 = vector.extract_strided_slice %125 {offsets = [0, 0], sizes = [2, 64], strides = [1, 1]} : vector<2x96xf32> to vector<2x64xf32>
    %128 = arith.addf %126, %127 : vector<2x64xf32>
    %129 = arith.negf %128 : vector<2x64xf32>
    %130 = math.exp %129 : vector<2x64xf32>
    %cst_36 = arith.constant 1.000000e+00 : f32
    %131 = vector.broadcast %cst_36 : f32 to vector<2x64xf32>
    %132 = arith.addf %131, %130 : vector<2x64xf32>
    %133 = arith.divf %131, %132 : vector<2x64xf32>
    %134 = vector.extract_strided_slice %133 {offsets = [0, 0], sizes = [2, 32], strides = [1, 1]} : vector<2x64xf32> to vector<2x32xf32>
    %135 = vector.extract_strided_slice %133 {offsets = [0, 32], sizes = [2, 32], strides = [1, 1]} : vector<2x64xf32> to vector<2x32xf32>
    %136 = vector.extract_strided_slice %122 {offsets = [0, 64], sizes = [2, 32], strides = [1, 1]} : vector<2x96xf32> to vector<2x32xf32>
    %137 = vector.extract_strided_slice %125 {offsets = [0, 64], sizes = [2, 32], strides = [1, 1]} : vector<2x96xf32> to vector<2x32xf32>
    %138 = arith.mulf %134, %137 : vector<2x32xf32>
    %139 = arith.addf %136, %138 : vector<2x32xf32>
    %140 = math.tanh %139 : vector<2x32xf32>
    %cst_37 = arith.constant 1.000000e+00 : f32
    %141 = vector.broadcast %cst_37 : f32 to vector<2x32xf32>
    %142 = arith.subf %141, %135 : vector<2x32xf32>
    %143 = arith.mulf %142, %140 : vector<2x32xf32>
    %144 = arith.mulf %135, %100 : vector<2x32xf32>
    %145 = arith.addf %143, %144 : vector<2x32xf32>
    %146 = arith.index_cast %108 : i32 to index
    %c0_38 = arith.constant 0 : index
    %c0_39 = arith.constant 0 : index
    %147 = vector.load %arg4[%146, %c0_38, %c0_39] : memref<4x2x96xbf16, #tpu.memory_space<vmem>>, vector<1x2x96xbf16>
    %148 = vector.shape_cast %147 : vector<1x2x96xbf16> to vector<2x96xbf16>
    %149 = arith.extf %148 : vector<2x96xbf16> to vector<2x96xf32>
    %150 = arith.truncf %107 : vector<2x32xf32> to vector<2x32xbf16>
    %cst_40 = arith.constant dense<0.000000e+00> : vector<2x96xf32>
    %151 = tpu.matmul %150, %4, %cst_40 {dimension_numbers = #tpu.dot_dimension_numbers<[1], [0], [0], [1], [0, 0, 1, 1], [], []>} : vector<2x32xbf16>, vector<32x96xbf16>, vector<2x96xf32> -> vector<2x96xf32>
    %152 = arith.addf %151, %10 : vector<2x96xf32>
    %153 = vector.extract_strided_slice %149 {offsets = [0, 0], sizes = [2, 64], strides = [1, 1]} : vector<2x96xf32> to vector<2x64xf32>
    %154 = vector.extract_strided_slice %152 {offsets = [0, 0], sizes = [2, 64], strides = [1, 1]} : vector<2x96xf32> to vector<2x64xf32>
    %155 = arith.addf %153, %154 : vector<2x64xf32>
    %156 = arith.negf %155 : vector<2x64xf32>
    %157 = math.exp %156 : vector<2x64xf32>
    %cst_41 = arith.constant 1.000000e+00 : f32
    %158 = vector.broadcast %cst_41 : f32 to vector<2x64xf32>
    %159 = arith.addf %158, %157 : vector<2x64xf32>
    %160 = arith.divf %158, %159 : vector<2x64xf32>
    %161 = vector.extract_strided_slice %160 {offsets = [0, 0], sizes = [2, 32], strides = [1, 1]} : vector<2x64xf32> to vector<2x32xf32>
    %162 = vector.extract_strided_slice %160 {offsets = [0, 32], sizes = [2, 32], strides = [1, 1]} : vector<2x64xf32> to vector<2x32xf32>
    %163 = vector.extract_strided_slice %149 {offsets = [0, 64], sizes = [2, 32], strides = [1, 1]} : vector<2x96xf32> to vector<2x32xf32>
    %164 = vector.extract_strided_slice %152 {offsets = [0, 64], sizes = [2, 32], strides = [1, 1]} : vector<2x96xf32> to vector<2x32xf32>
    %165 = arith.mulf %161, %164 : vector<2x32xf32>
    %166 = arith.addf %163, %165 : vector<2x32xf32>
    %167 = math.tanh %166 : vector<2x32xf32>
    %cst_42 = arith.constant 1.000000e+00 : f32
    %168 = vector.broadcast %cst_42 : f32 to vector<2x32xf32>
    %169 = arith.subf %168, %162 : vector<2x32xf32>
    %170 = arith.mulf %169, %167 : vector<2x32xf32>
    %171 = arith.mulf %162, %107 : vector<2x32xf32>
    %172 = arith.addf %170, %171 : vector<2x32xf32>
    %173 = vector.broadcast %114 : vector<2x1xf32> to vector<2x32xf32>
    %174 = arith.mulf %173, %145 : vector<2x32xf32>
    %175 = arith.index_cast %c1_i32_31 : i32 to index
    %c0_43 = arith.constant 0 : index
    %c0_44 = arith.constant 0 : index
    %176 = vector.load %arg9[%175, %c0_43, %c0_44] : memref<4x2x32xf32, #tpu.memory_space<vmem>>, vector<1x2x32xf32>
    %177 = vector.shape_cast %176 : vector<1x2x32xf32> to vector<2x32xf32>
    %178 = vector.shape_cast %174 : vector<2x32xf32> to vector<1x2x32xf32>
    tpu.vector_store %arg9[%175, %c0_43, %c0_44], %178 {strides = array<i32>} : memref<4x2x32xf32, #tpu.memory_space<vmem>>, vector<1x2x32xf32>,
    %179 = vector.broadcast %118 : vector<2x1xf32> to vector<2x32xf32>
    %180 = arith.mulf %179, %172 : vector<2x32xf32>
    %181 = arith.index_cast %108 : i32 to index
    %c0_45 = arith.constant 0 : index
    %c0_46 = arith.constant 0 : index
    %182 = vector.load %arg10[%181, %c0_45, %c0_46] : memref<4x2x32xf32, #tpu.memory_space<vmem>>, vector<1x2x32xf32>
    %183 = vector.shape_cast %182 : vector<1x2x32xf32> to vector<2x32xf32>
    %184 = vector.shape_cast %180 : vector<2x32xf32> to vector<1x2x32xf32>
    tpu.vector_store %arg10[%181, %c0_45, %c0_46], %184 {strides = array<i32>} : memref<4x2x32xf32, #tpu.memory_space<vmem>>, vector<1x2x32xf32>,
    %185 = vector.broadcast %114 : vector<2x1xf32> to vector<2x32xf32>
    %186 = arith.mulf %185, %145 : vector<2x32xf32>
    %cst_47 = arith.constant 1.000000e+00 : f32
    %187 = vector.broadcast %cst_47 : f32 to vector<2x1xf32>
    %188 = arith.subf %187, %114 : vector<2x1xf32>
    %189 = vector.broadcast %188 : vector<2x1xf32> to vector<2x32xf32>
    %190 = arith.mulf %189, %100 : vector<2x32xf32>
    %191 = arith.addf %186, %190 : vector<2x32xf32>
    %192 = vector.broadcast %118 : vector<2x1xf32> to vector<2x32xf32>
    %193 = arith.mulf %192, %172 : vector<2x32xf32>
    %cst_48 = arith.constant 1.000000e+00 : f32
    %194 = vector.broadcast %cst_48 : f32 to vector<2x1xf32>
    %195 = arith.subf %194, %118 : vector<2x1xf32>
    %196 = vector.broadcast %195 : vector<2x1xf32> to vector<2x32xf32>
    %197 = arith.mulf %196, %107 : vector<2x32xf32>
    %198 = arith.addf %193, %197 : vector<2x32xf32>
    %c2_i32 = arith.constant 2 : i32
    %c3_i32_49 = arith.constant 3 : i32
    %199 = arith.subi %c3_i32_49, %c2_i32 : i32
    %200 = arith.addi %12, %c2_i32 : i32
    %201 = arith.addi %14, %199 : i32
    %202 = vector.broadcast %200 : i32 to vector<2x1xi32>
    %203 = arith.cmpi slt, %202, %11 : vector<2x1xi32>
    %204 = arith.extui %203 : vector<2x1xi1> to vector<2x1xi32>
    %205 = arith.sitofp %204 : vector<2x1xi32> to vector<2x1xf32>
    %206 = vector.broadcast %201 : i32 to vector<2x1xi32>
    %207 = arith.cmpi slt, %206, %11 : vector<2x1xi32>
    %208 = arith.extui %207 : vector<2x1xi1> to vector<2x1xi32>
    %209 = arith.sitofp %208 : vector<2x1xi32> to vector<2x1xf32>
    %210 = arith.index_cast %c2_i32 : i32 to index
    %c0_50 = arith.constant 0 : index
    %c0_51 = arith.constant 0 : index
    %211 = vector.load %arg3[%210, %c0_50, %c0_51] : memref<4x2x96xbf16, #tpu.memory_space<vmem>>, vector<1x2x96xbf16>
    %212 = vector.shape_cast %211 : vector<1x2x96xbf16> to vector<2x96xbf16>
    %213 = arith.extf %212 : vector<2x96xbf16> to vector<2x96xf32>
    %214 = arith.truncf %191 : vector<2x32xf32> to vector<2x32xbf16>
    %cst_52 = arith.constant dense<0.000000e+00> : vector<2x96xf32>
    %215 = tpu.matmul %214, %3, %cst_52 {dimension_numbers = #tpu.dot_dimension_numbers<[1], [0], [0], [1], [0, 0, 1, 1], [], []>} : vector<2x32xbf16>, vector<32x96xbf16>, vector<2x96xf32> -> vector<2x96xf32>
    %216 = arith.addf %215, %7 : vector<2x96xf32>
    %217 = vector.extract_strided_slice %213 {offsets = [0, 0], sizes = [2, 64], strides = [1, 1]} : vector<2x96xf32> to vector<2x64xf32>
    %218 = vector.extract_strided_slice %216 {offsets = [0, 0], sizes = [2, 64], strides = [1, 1]} : vector<2x96xf32> to vector<2x64xf32>
    %219 = arith.addf %217, %218 : vector<2x64xf32>
    %220 = arith.negf %219 : vector<2x64xf32>
    %221 = math.exp %220 : vector<2x64xf32>
    %cst_53 = arith.constant 1.000000e+00 : f32
    %222 = vector.broadcast %cst_53 : f32 to vector<2x64xf32>
    %223 = arith.addf %222, %221 : vector<2x64xf32>
    %224 = arith.divf %222, %223 : vector<2x64xf32>
    %225 = vector.extract_strided_slice %224 {offsets = [0, 0], sizes = [2, 32], strides = [1, 1]} : vector<2x64xf32> to vector<2x32xf32>
    %226 = vector.extract_strided_slice %224 {offsets = [0, 32], sizes = [2, 32], strides = [1, 1]} : vector<2x64xf32> to vector<2x32xf32>
    %227 = vector.extract_strided_slice %213 {offsets = [0, 64], sizes = [2, 32], strides = [1, 1]} : vector<2x96xf32> to vector<2x32xf32>
    %228 = vector.extract_strided_slice %216 {offsets = [0, 64], sizes = [2, 32], strides = [1, 1]} : vector<2x96xf32> to vector<2x32xf32>
    %229 = arith.mulf %225, %228 : vector<2x32xf32>
    %230 = arith.addf %227, %229 : vector<2x32xf32>
    %231 = math.tanh %230 : vector<2x32xf32>
    %cst_54 = arith.constant 1.000000e+00 : f32
    %232 = vector.broadcast %cst_54 : f32 to vector<2x32xf32>
    %233 = arith.subf %232, %226 : vector<2x32xf32>
    %234 = arith.mulf %233, %231 : vector<2x32xf32>
    %235 = arith.mulf %226, %191 : vector<2x32xf32>
    %236 = arith.addf %234, %235 : vector<2x32xf32>
    %237 = arith.index_cast %199 : i32 to index
    %c0_55 = arith.constant 0 : index
    %c0_56 = arith.constant 0 : index
    %238 = vector.load %arg4[%237, %c0_55, %c0_56] : memref<4x2x96xbf16, #tpu.memory_space<vmem>>, vector<1x2x96xbf16>
    %239 = vector.shape_cast %238 : vector<1x2x96xbf16> to vector<2x96xbf16>
    %240 = arith.extf %239 : vector<2x96xbf16> to vector<2x96xf32>
    %241 = arith.truncf %198 : vector<2x32xf32> to vector<2x32xbf16>
    %cst_57 = arith.constant dense<0.000000e+00> : vector<2x96xf32>
    %242 = tpu.matmul %241, %4, %cst_57 {dimension_numbers = #tpu.dot_dimension_numbers<[1], [0], [0], [1], [0, 0, 1, 1], [], []>} : vector<2x32xbf16>, vector<32x96xbf16>, vector<2x96xf32> -> vector<2x96xf32>
    %243 = arith.addf %242, %10 : vector<2x96xf32>
    %244 = vector.extract_strided_slice %240 {offsets = [0, 0], sizes = [2, 64], strides = [1, 1]} : vector<2x96xf32> to vector<2x64xf32>
    %245 = vector.extract_strided_slice %243 {offsets = [0, 0], sizes = [2, 64], strides = [1, 1]} : vector<2x96xf32> to vector<2x64xf32>
    %246 = arith.addf %244, %245 : vector<2x64xf32>
    %247 = arith.negf %246 : vector<2x64xf32>
    %248 = math.exp %247 : vector<2x64xf32>
    %cst_58 = arith.constant 1.000000e+00 : f32
    %249 = vector.broadcast %cst_58 : f32 to vector<2x64xf32>
    %250 = arith.addf %249, %248 : vector<2x64xf32>
    %251 = arith.divf %249, %250 : vector<2x64xf32>
    %252 = vector.extract_strided_slice %251 {offsets = [0, 0], sizes = [2, 32], strides = [1, 1]} : vector<2x64xf32> to vector<2x32xf32>
    %253 = vector.extract_strided_slice %251 {offsets = [0, 32], sizes = [2, 32], strides = [1, 1]} : vector<2x64xf32> to vector<2x32xf32>
    %254 = vector.extract_strided_slice %240 {offsets = [0, 64], sizes = [2, 32], strides = [1, 1]} : vector<2x96xf32> to vector<2x32xf32>
    %255 = vector.extract_strided_slice %243 {offsets = [0, 64], sizes = [2, 32], strides = [1, 1]} : vector<2x96xf32> to vector<2x32xf32>
    %256 = arith.mulf %252, %255 : vector<2x32xf32>
    %257 = arith.addf %254, %256 : vector<2x32xf32>
    %258 = math.tanh %257 : vector<2x32xf32>
    %cst_59 = arith.constant 1.000000e+00 : f32
    %259 = vector.broadcast %cst_59 : f32 to vector<2x32xf32>
    %260 = arith.subf %259, %253 : vector<2x32xf32>
    %261 = arith.mulf %260, %258 : vector<2x32xf32>
    %262 = arith.mulf %253, %198 : vector<2x32xf32>
    %263 = arith.addf %261, %262 : vector<2x32xf32>
    %264 = vector.broadcast %205 : vector<2x1xf32> to vector<2x32xf32>
    %265 = arith.mulf %264, %236 : vector<2x32xf32>
    %266 = arith.index_cast %c2_i32 : i32 to index
    %c0_60 = arith.constant 0 : index
    %c0_61 = arith.constant 0 : index
    %267 = vector.load %arg9[%266, %c0_60, %c0_61] : memref<4x2x32xf32, #tpu.memory_space<vmem>>, vector<1x2x32xf32>
    %268 = vector.shape_cast %267 : vector<1x2x32xf32> to vector<2x32xf32>
    %269 = vector.shape_cast %265 : vector<2x32xf32> to vector<1x2x32xf32>
    tpu.vector_store %arg9[%266, %c0_60, %c0_61], %269 {strides = array<i32>} : memref<4x2x32xf32, #tpu.memory_space<vmem>>, vector<1x2x32xf32>,
    %270 = vector.broadcast %209 : vector<2x1xf32> to vector<2x32xf32>
    %271 = arith.mulf %270, %263 : vector<2x32xf32>
    %272 = arith.index_cast %199 : i32 to index
    %c0_62 = arith.constant 0 : index
    %c0_63 = arith.constant 0 : index
    %273 = vector.load %arg10[%272, %c0_62, %c0_63] : memref<4x2x32xf32, #tpu.memory_space<vmem>>, vector<1x2x32xf32>
    %274 = vector.shape_cast %273 : vector<1x2x32xf32> to vector<2x32xf32>
    %275 = vector.shape_cast %271 : vector<2x32xf32> to vector<1x2x32xf32>
    tpu.vector_store %arg10[%272, %c0_62, %c0_63], %275 {strides = array<i32>} : memref<4x2x32xf32, #tpu.memory_space<vmem>>, vector<1x2x32xf32>,
    %276 = vector.broadcast %205 : vector<2x1xf32> to vector<2x32xf32>
    %277 = arith.mulf %276, %236 : vector<2x32xf32>
    %cst_64 = arith.constant 1.000000e+00 : f32
    %278 = vector.broadcast %cst_64 : f32 to vector<2x1xf32>
    %279 = arith.subf %278, %205 : vector<2x1xf32>
    %280 = vector.broadcast %279 : vector<2x1xf32> to vector<2x32xf32>
    %281 = arith.mulf %280, %191 : vector<2x32xf32>
    %282 = arith.addf %277, %281 : vector<2x32xf32>
    %283 = vector.broadcast %209 : vector<2x1xf32> to vector<2x32xf32>
    %284 = arith.mulf %283, %263 : vector<2x32xf32>
    %cst_65 = arith.constant 1.000000e+00 : f32
    %285 = vector.broadcast %cst_65 : f32 to vector<2x1xf32>
    %286 = arith.subf %285, %209 : vector<2x1xf32>
    %287 = vector.broadcast %286 : vector<2x1xf32> to vector<2x32xf32>
    %288 = arith.mulf %287, %198 : vector<2x32xf32>
    %289 = arith.addf %284, %288 : vector<2x32xf32>
    %c3_i32_66 = arith.constant 3 : i32
    %c3_i32_67 = arith.constant 3 : i32
    %290 = arith.subi %c3_i32_67, %c3_i32_66 : i32
    %291 = arith.addi %12, %c3_i32_66 : i32
    %292 = arith.addi %14, %290 : i32
    %293 = vector.broadcast %291 : i32 to vector<2x1xi32>
    %294 = arith.cmpi slt, %293, %11 : vector<2x1xi32>
    %295 = arith.extui %294 : vector<2x1xi1> to vector<2x1xi32>
    %296 = arith.sitofp %295 : vector<2x1xi32> to vector<2x1xf32>
    %297 = vector.broadcast %292 : i32 to vector<2x1xi32>
    %298 = arith.cmpi slt, %297, %11 : vector<2x1xi32>
    %299 = arith.extui %298 : vector<2x1xi1> to vector<2x1xi32>
    %300 = arith.sitofp %299 : vector<2x1xi32> to vector<2x1xf32>
    %301 = arith.index_cast %c3_i32_66 : i32 to index
    %c0_68 = arith.constant 0 : index
    %c0_69 = arith.constant 0 : index
    %302 = vector.load %arg3[%301, %c0_68, %c0_69] : memref<4x2x96xbf16, #tpu.memory_space<vmem>>, vector<1x2x96xbf16>
    %303 = vector.shape_cast %302 : vector<1x2x96xbf16> to vector<2x96xbf16>
    %304 = arith.extf %303 : vector<2x96xbf16> to vector<2x96xf32>
    %305 = arith.truncf %282 : vector<2x32xf32> to vector<2x32xbf16>
    %cst_70 = arith.constant dense<0.000000e+00> : vector<2x96xf32>
    %306 = tpu.matmul %305, %3, %cst_70 {dimension_numbers = #tpu.dot_dimension_numbers<[1], [0], [0], [1], [0, 0, 1, 1], [], []>} : vector<2x32xbf16>, vector<32x96xbf16>, vector<2x96xf32> -> vector<2x96xf32>
    %307 = arith.addf %306, %7 : vector<2x96xf32>
    %308 = vector.extract_strided_slice %304 {offsets = [0, 0], sizes = [2, 64], strides = [1, 1]} : vector<2x96xf32> to vector<2x64xf32>
    %309 = vector.extract_strided_slice %307 {offsets = [0, 0], sizes = [2, 64], strides = [1, 1]} : vector<2x96xf32> to vector<2x64xf32>
    %310 = arith.addf %308, %309 : vector<2x64xf32>
    %311 = arith.negf %310 : vector<2x64xf32>
    %312 = math.exp %311 : vector<2x64xf32>
    %cst_71 = arith.constant 1.000000e+00 : f32
    %313 = vector.broadcast %cst_71 : f32 to vector<2x64xf32>
    %314 = arith.addf %313, %312 : vector<2x64xf32>
    %315 = arith.divf %313, %314 : vector<2x64xf32>
    %316 = vector.extract_strided_slice %315 {offsets = [0, 0], sizes = [2, 32], strides = [1, 1]} : vector<2x64xf32> to vector<2x32xf32>
    %317 = vector.extract_strided_slice %315 {offsets = [0, 32], sizes = [2, 32], strides = [1, 1]} : vector<2x64xf32> to vector<2x32xf32>
    %318 = vector.extract_strided_slice %304 {offsets = [0, 64], sizes = [2, 32], strides = [1, 1]} : vector<2x96xf32> to vector<2x32xf32>
    %319 = vector.extract_strided_slice %307 {offsets = [0, 64], sizes = [2, 32], strides = [1, 1]} : vector<2x96xf32> to vector<2x32xf32>
    %320 = arith.mulf %316, %319 : vector<2x32xf32>
    %321 = arith.addf %318, %320 : vector<2x32xf32>
    %322 = math.tanh %321 : vector<2x32xf32>
    %cst_72 = arith.constant 1.000000e+00 : f32
    %323 = vector.broadcast %cst_72 : f32 to vector<2x32xf32>
    %324 = arith.subf %323, %317 : vector<2x32xf32>
    %325 = arith.mulf %324, %322 : vector<2x32xf32>
    %326 = arith.mulf %317, %282 : vector<2x32xf32>
    %327 = arith.addf %325, %326 : vector<2x32xf32>
    %328 = arith.index_cast %290 : i32 to index
    %c0_73 = arith.constant 0 : index
    %c0_74 = arith.constant 0 : index
    %329 = vector.load %arg4[%328, %c0_73, %c0_74] : memref<4x2x96xbf16, #tpu.memory_space<vmem>>, vector<1x2x96xbf16>
    %330 = vector.shape_cast %329 : vector<1x2x96xbf16> to vector<2x96xbf16>
    %331 = arith.extf %330 : vector<2x96xbf16> to vector<2x96xf32>
    %332 = arith.truncf %289 : vector<2x32xf32> to vector<2x32xbf16>
    %cst_75 = arith.constant dense<0.000000e+00> : vector<2x96xf32>
    %333 = tpu.matmul %332, %4, %cst_75 {dimension_numbers = #tpu.dot_dimension_numbers<[1], [0], [0], [1], [0, 0, 1, 1], [], []>} : vector<2x32xbf16>, vector<32x96xbf16>, vector<2x96xf32> -> vector<2x96xf32>
    %334 = arith.addf %333, %10 : vector<2x96xf32>
    %335 = vector.extract_strided_slice %331 {offsets = [0, 0], sizes = [2, 64], strides = [1, 1]} : vector<2x96xf32> to vector<2x64xf32>
    %336 = vector.extract_strided_slice %334 {offsets = [0, 0], sizes = [2, 64], strides = [1, 1]} : vector<2x96xf32> to vector<2x64xf32>
    %337 = arith.addf %335, %336 : vector<2x64xf32>
    %338 = arith.negf %337 : vector<2x64xf32>
    %339 = math.exp %338 : vector<2x64xf32>
    %cst_76 = arith.constant 1.000000e+00 : f32
    %340 = vector.broadcast %cst_76 : f32 to vector<2x64xf32>
    %341 = arith.addf %340, %339 : vector<2x64xf32>
    %342 = arith.divf %340, %341 : vector<2x64xf32>
    %343 = vector.extract_strided_slice %342 {offsets = [0, 0], sizes = [2, 32], strides = [1, 1]} : vector<2x64xf32> to vector<2x32xf32>
    %344 = vector.extract_strided_slice %342 {offsets = [0, 32], sizes = [2, 32], strides = [1, 1]} : vector<2x64xf32> to vector<2x32xf32>
    %345 = vector.extract_strided_slice %331 {offsets = [0, 64], sizes = [2, 32], strides = [1, 1]} : vector<2x96xf32> to vector<2x32xf32>
    %346 = vector.extract_strided_slice %334 {offsets = [0, 64], sizes = [2, 32], strides = [1, 1]} : vector<2x96xf32> to vector<2x32xf32>
    %347 = arith.mulf %343, %346 : vector<2x32xf32>
    %348 = arith.addf %345, %347 : vector<2x32xf32>
    %349 = math.tanh %348 : vector<2x32xf32>
    %cst_77 = arith.constant 1.000000e+00 : f32
    %350 = vector.broadcast %cst_77 : f32 to vector<2x32xf32>
    %351 = arith.subf %350, %344 : vector<2x32xf32>
    %352 = arith.mulf %351, %349 : vector<2x32xf32>
    %353 = arith.mulf %344, %289 : vector<2x32xf32>
    %354 = arith.addf %352, %353 : vector<2x32xf32>
    %355 = vector.broadcast %296 : vector<2x1xf32> to vector<2x32xf32>
    %356 = arith.mulf %355, %327 : vector<2x32xf32>
    %357 = arith.index_cast %c3_i32_66 : i32 to index
    %c0_78 = arith.constant 0 : index
    %c0_79 = arith.constant 0 : index
    %358 = vector.load %arg9[%357, %c0_78, %c0_79] : memref<4x2x32xf32, #tpu.memory_space<vmem>>, vector<1x2x32xf32>
    %359 = vector.shape_cast %358 : vector<1x2x32xf32> to vector<2x32xf32>
    %360 = vector.shape_cast %356 : vector<2x32xf32> to vector<1x2x32xf32>
    tpu.vector_store %arg9[%357, %c0_78, %c0_79], %360 {strides = array<i32>} : memref<4x2x32xf32, #tpu.memory_space<vmem>>, vector<1x2x32xf32>,
    %361 = vector.broadcast %300 : vector<2x1xf32> to vector<2x32xf32>
    %362 = arith.mulf %361, %354 : vector<2x32xf32>
    %363 = arith.index_cast %290 : i32 to index
    %c0_80 = arith.constant 0 : index
    %c0_81 = arith.constant 0 : index
    %364 = vector.load %arg10[%363, %c0_80, %c0_81] : memref<4x2x32xf32, #tpu.memory_space<vmem>>, vector<1x2x32xf32>
    %365 = vector.shape_cast %364 : vector<1x2x32xf32> to vector<2x32xf32>
    %366 = vector.shape_cast %362 : vector<2x32xf32> to vector<1x2x32xf32>
    tpu.vector_store %arg10[%363, %c0_80, %c0_81], %366 {strides = array<i32>} : memref<4x2x32xf32, #tpu.memory_space<vmem>>, vector<1x2x32xf32>,
    %367 = vector.broadcast %296 : vector<2x1xf32> to vector<2x32xf32>
    %368 = arith.mulf %367, %327 : vector<2x32xf32>
    %cst_82 = arith.constant 1.000000e+00 : f32
    %369 = vector.broadcast %cst_82 : f32 to vector<2x1xf32>
    %370 = arith.subf %369, %296 : vector<2x1xf32>
    %371 = vector.broadcast %370 : vector<2x1xf32> to vector<2x32xf32>
    %372 = arith.mulf %371, %282 : vector<2x32xf32>
    %373 = arith.addf %368, %372 : vector<2x32xf32>
    %374 = vector.broadcast %300 : vector<2x1xf32> to vector<2x32xf32>
    %375 = arith.mulf %374, %354 : vector<2x32xf32>
    %cst_83 = arith.constant 1.000000e+00 : f32
    %376 = vector.broadcast %cst_83 : f32 to vector<2x1xf32>
    %377 = arith.subf %376, %300 : vector<2x1xf32>
    %378 = vector.broadcast %377 : vector<2x1xf32> to vector<2x32xf32>
    %379 = arith.mulf %378, %289 : vector<2x32xf32>
    %380 = arith.addf %375, %379 : vector<2x32xf32>
    %c4_i32_84 = arith.constant 4 : i32
    %c0_85 = arith.constant 0 : index
    %c0_86 = arith.constant 0 : index
    %381 = vector.load %arg12[%c0_85, %c0_86] : memref<2x32xf32, #tpu.memory_space<vmem>>, vector<2x32xf32>
    tpu.vector_store %arg12[%c0_85, %c0_86], %373 {strides = array<i32>} : memref<2x32xf32, #tpu.memory_space<vmem>>, vector<2x32xf32>,
    %c0_87 = arith.constant 0 : index
    %c0_88 = arith.constant 0 : index
    %382 = vector.load %arg13[%c0_87, %c0_88] : memref<2x32xf32, #tpu.memory_space<vmem>>, vector<2x32xf32>
    tpu.vector_store %arg13[%c0_87, %c0_88], %380 {strides = array<i32>} : memref<2x32xf32, #tpu.memory_space<vmem>>, vector<2x32xf32>,
    %c1_i32_89 = arith.constant 1 : i32
    %383 = arith.cmpi eq, %arg1, %c1_i32_89 : i32
    %384 = arith.extui %383 : i1 to i32
    %c0_i32_90 = arith.constant 0 : i32
    %385 = arith.cmpi ne, %384, %c0_i32_90 : i32
    scf.if %385 {
      %386 = arith.addf %373, %380 : vector<2x32xf32>
      %c0_91 = arith.constant 0 : index
      %c0_92 = arith.constant 0 : index
      %387 = vector.load %arg11[%c0_91, %c0_92] : memref<2x32xf32, #tpu.memory_space<vmem>>, vector<2x32xf32>
      tpu.vector_store %arg11[%c0_91, %c0_92], %386 {strides = array<i32>} : memref<2x32xf32, #tpu.memory_space<vmem>>, vector<2x32xf32>,
    } else {
    }
    return
  }
  func.func @transform_0(%arg0: i32, %arg1: i32) -> (i32, i32) {
    %c0_i32 = arith.constant 0 : i32
    %c0_i32_0 = arith.constant 0 : i32
    return %arg0, %c0_i32 : i32, i32
  }
  func.func @transform_1(%arg0: i32, %arg1: i32) -> (i32, i32, i32) {
    %c0_i32 = arith.constant 0 : i32
    %c0_i32_0 = arith.constant 0 : i32
    return %arg1, %arg0, %c0_i32 : i32, i32, i32
  }
  func.func @transform_2(%arg0: i32, %arg1: i32) -> (i32, i32, i32) {
    %c1_i32 = arith.constant 1 : i32
    %0 = arith.subi %c1_i32, %arg1 : i32
    %c0_i32 = arith.constant 0 : i32
    %c0_i32_0 = arith.constant 0 : i32
    return %0, %arg0, %c0_i32 : i32, i32, i32
  }
  func.func @transform_3(%arg0: i32, %arg1: i32) -> (i32, i32) {
    %c0_i32 = arith.constant 0 : i32
    %c0_i32_0 = arith.constant 0 : i32
    %c0_i32_1 = arith.constant 0 : i32
    return %c0_i32, %c0_i32_0 : i32, i32
  }
  func.func @transform_4(%arg0: i32, %arg1: i32) -> (i32, i32) {
    %c0_i32 = arith.constant 0 : i32
    %c0_i32_0 = arith.constant 0 : i32
    %c0_i32_1 = arith.constant 0 : i32
    return %c0_i32, %c0_i32_0 : i32, i32
  }
  func.func @transform_5(%arg0: i32, %arg1: i32) -> (i32, i32) {
    %c0_i32 = arith.constant 0 : i32
    %c0_i32_0 = arith.constant 0 : i32
    %c0_i32_1 = arith.constant 0 : i32
    return %c0_i32, %c0_i32_0 : i32, i32
  }
  func.func @transform_6(%arg0: i32, %arg1: i32) -> (i32, i32) {
    %c0_i32 = arith.constant 0 : i32
    %c0_i32_0 = arith.constant 0 : i32
    %c0_i32_1 = arith.constant 0 : i32
    return %c0_i32, %c0_i32_0 : i32, i32
  }
  func.func @transform_7(%arg0: i32, %arg1: i32) -> (i32, i32, i32) {
    %c0_i32 = arith.constant 0 : i32
    %c0_i32_0 = arith.constant 0 : i32
    return %arg1, %arg0, %c0_i32 : i32, i32, i32
  }
  func.func @transform_8(%arg0: i32, %arg1: i32) -> (i32, i32, i32) {
    %c1_i32 = arith.constant 1 : i32
    %0 = arith.subi %c1_i32, %arg1 : i32
    %c0_i32 = arith.constant 0 : i32
    %c0_i32_0 = arith.constant 0 : i32
    return %0, %arg0, %c0_i32 : i32, i32, i32
  }
  func.func @transform_9(%arg0: i32, %arg1: i32) -> (i32, i32) {
    %c0_i32 = arith.constant 0 : i32
    %c0_i32_0 = arith.constant 0 : i32
    return %arg0, %c0_i32 : i32, i32
  }
}

</mosaic_0001>

<bundles_post_ra>
// kernel: tpu_custom_call.1
= control target key start
LH: loop header
LB: loop body
LE: loop exit
PB: predicated region body
PF: predicated region fallthrough
CT: control target
= control target key end

     0   :  { %s3124_s0 = inlined_call_operand.vmem [shape: s32[2,1], index: 0, kind: input, shape index: {}]   ;;  %s3125_s1 = inlined_call_operand.hbm [shape: bf16[8,2,96], index: 1, kind: input, shape index: {}]   ;;  %s3126_s2 = inlined_call_operand.hbm [shape: bf16[8,2,96], index: 2, kind: input, shape index: {}]   ;;  %s3127_s3 = inlined_call_operand.hbm [shape: bf16[32,96], index: 3, kind: input, shape index: {}]   ;;  %s3128_s4 = inlined_call_operand.vmem [shape: bf16[32,96], index: 4, kind: input, shape index: {}]   ;;  %s3129_s5 = inlined_call_operand.vmem [shape: f32[1,96], index: 5, kind: input, shape index: {}]   ;;  %s3130_s6 = inlined_call_operand.vmem [shape: f32[1,96], index: 6, kind: input, shape index: {}]   ;;  %s3131_s7 = inlined_call_operand.hbm [shape: f32[8,2,32], index: 7, kind: output, shape index: {0}]   ;;  %s3132_s8 = inlined_call_operand.hbm [shape: f32[8,2,32], index: 8, kind: output, shape index: {1}]   ;;  %s3133_s9 = inlined_call_operand.hbm [shape: f32[2,32], index: 9, kind: output, shape index: {2}]  }
   0x1   :  { %3151 = sst [smem:[#allocation26_spill]] %s3124_s0 }
   0x2   :  { %3152 = sst [smem:[#allocation27_spill]] %s3125_s1 }
   0x3   :  { %3153 = sst [smem:[#allocation28_spill]] %s3127_s3 }
   0x4   :  { %3154 = sst [smem:[#allocation29_spill]] %s3131_s7 }
   0x5   :  { %3155 = sst [smem:[#allocation30_spill]] %s3133_s9 }
   0x6   :  { %15 = vsyncpa [#allocation5], 0 }
   0x7   :  { %17 = vsyncpa [#allocation5 + $0x1], 0 }
   0x8   :  { %18 = vsyncpa [#allocation8], 0 }
   0x9   :  { %20 = vsyncpa [#allocation8 + $0x1], 0 }
   0xa   :  { %21 = vsyncpa [#allocation6], 0 }
   0xb   :  { %23 = vsyncpa [#allocation6 + $0x1], 0 }
   0xc   :  { %24 = vsyncpa [#allocation12], 0 }
   0xd   :  { %26 = vsyncpa [#allocation12 + $0x1], 0  ;;  %s2449_s30 = smov 0   ;;  %s2451_s10 = smov 0  }
   0xe   :  { %s2453_s11 = smov 0   ;;  %s2455_s12 = smov 0  }
   0xf   :  { %s2457_s13 = smov 0   ;;  %s2459_s14 = smov 0  }
  0x10   :  { %s2461_s15 = smov 0   ;;  %s2463_s16 = smov 0  }
  0x11   :  { %s2465_s17 = smov 0  }
  0x12 LB: > { %3156 = sst [smem:[#allocation20_spill]] %s2358_s12  ;;  %s2493_s18 = sadd.s32 4294967295, %s2378_s17   ;;  %s2378_s17 = sphi %s2465_s17, %s32_s17   ;;  %s2374_s16 = sphi %s2463_s16, %s3213_s16   ;;  %s2370_s15 = sphi %s2461_s15, %s3212_s15   ;;  %s2366_s14 = sphi %s2459_s14, %s3211_s14   ;;  %s2362_s13 = sphi %s2457_s13, %s3210_s13   ;;  %s2358_s12 = sphi %s2455_s12, %s3209_s12   ;;  %s2354_s11 = sphi %s2453_s11, %s3208_s11   ;;  %s2350_s10 = sphi %s2451_s10, %s3207_s10   ;;  %s2346_s30 = sphi %s2449_s30, %s3206_s30  }
  0x13   : > { %3157 = sst [smem:[#allocation21_spill]] %s2366_s14  ;;  %s3134_s19 = sadd.s32 4294967294, %s2378_s17  }
  0x14   : > { %p92_p0 = scmp.ne.s32.totalorder %s2362_s13, %s2358_s12  ;;  %p3139_p1 = scmp.eq.s32.totalorder %s2493_s18, 0 }
  0x15   : > { %p122_p2 = scmp.ne.s32.totalorder %s2350_s10, %s2346_s30  ;;  %p238_p5 = scmp.eq.s32.totalorder %s3134_s19, 1 }
  0x16   : > { %p2503_p4 = por %p3139_p1, %p92_p0  ;;  %p1749_p7 = scmp.ge.s32.totalorder %s2378_s17, 1 }
  0x17   : > { %p2511_p6 = por %p122_p2, %p3139_p1  ;;  %p2516_p8 = por %p238_p5, %p92_p0 }
  0x18   : > { %s3158_s20 = scalar_select %p2503_p4, 1, 0 }
  0x19   : > { %s3159_s21 = scalar_select %p2511_p6, 1, 0 }
  0x1a   : > { %s3160_s22 = scalar_select %p2516_p8, 1, 0 }
  0x1b   : > { %p2520_p9 = por %p238_p5, %p122_p2  ;;  %p301_p10 = scmp.lt.s32.totalorder %s2378_s17, 3 }
  0x1c   : > { %3161 = sst [smem:[#allocation22_spill]] %s3160_s22  ;;  %s2380_s25 = smov [#allocation9]  }
  0x1d   : > { %s3162_s23 = scalar_select %p2520_p9, 1, 0 }
  0x1e   : > { %p2525_p11 = pnand %p1749_p7, %p301_p10  ;;  %s320_s26 = sshll.u32 %s2380_s25, 4  ;;  %s321_s26 = int_to_ptr.vmem [resolvable:$true] %s320_s26 }
  0x1f   : > { %3163 = sst [smem:[#allocation23_spill]] %s3162_s23  ;;  %s41_s28 = sadd.s32 1, %s2374_s16 }
  0x20   : > { %s3164_s24 = scalar_select %p2525_p11, 1, 0 }
  0x21   : > { %p1929_p12 = pneg %p2525_p11  ;;  %p2539_p2 = scmp.ge.s32.totalorder %s41_s28, 2 }
  0x22   : > { %s3167_s3 = sld [smem:[#allocation28_spill]] }
  0x23   : > { %p2534_p0 = pnand %p1929_p12, %p3139_p1 }
  0x24   : > { %s3166_s29 = scalar_select %p2539_p2, 1, 0 }
  0x25   : > { %p2116_p7 = pneg %p2534_p0 }
  0x28   : > { %s2114_s23 = scalar_lea.hbm %s3167_s3, 256 }
  0x29   : > { %p2115_p5 = scmp.ne.s32.totalorder %s3167_s3, %s2114_s23  ;;  %p2121_p13 = scmp.lt.u32.totalorder %s2114_s23, %s3167_s3 }
  0x2b   : > { %p2117_p10 = pnand %p2116_p7, %p2115_p5 }
  0x2d   : > { %p2118_p12 = pneg %p2117_p10 }
  0x2f   : > { %p2123_p1 = pnand %p2121_p13, %p2118_p12 }
  0x31   : > { %2126 = shalt.err (!%p2123_p1)
}
  0x32   : > { %s2127_s7 = scalar_lea.vmem %s321_s26, 256  ;;  %p2135_p6 = scmp.lt.s32.totalorder %s321_s26, %s321_s26 }
  0x33   : > { %p2128_p3 = scmp.ne.s32.totalorder %s321_s26, %s2127_s7  ;;  %p2136_p4 = scmp.lt.s32.totalorder %s2127_s7, %s2127_s7 }
  0x35   : > { %p2130_p9 = pnand %p2128_p3, %p2116_p7  ;;  %p2137_p11 = por %p2136_p4, %p2135_p6 }
  0x37   : > { %p2131_p8 = pneg %p2130_p9 }
  0x39   : > { %p2138_p2 = pnand %p2137_p11, %p2131_p8 }
  0x3b   : > { %2141 = shalt.err (!%p2138_p2)
}
  0x3c   : > { %s2381_s19 = smov 64   ;;  %s2382_s9 = smov 4  }
  0x3d   : > { %1932 = dma.hbm_to_vmem [thread:$0]  (!%p2534_p0), %s3167_s3, 256, %s321_s26, [#allocation8], %s2381_s19, %s2381_s19, %s2382_s9  }
  0x3e   : > { %p3168_p1 = scmp.ne.s32.totalorder %s3166_s29, 0  ;;  %s79_s22 = sadd.s32 1, %s2366_s14 }
  0x3f   : > { %p86_p3 = scmp.ne.s32.totalorder %s2366_s14, %s2362_s13  ;;  %p3145_p4 = scmp.eq.s32.totalorder %s2378_s17, 0 }
  0x40   : > { %s3215_s28 = smov (%p3168_p1, %s41_s28), 0  ;;  %p3169_p8 = scmp.eq.s32.totalorder %s2493_s18, 1 }
  0x41   : > { %s74_s23 = ssub.s32 %s2374_s16, %s3215_s28  ;;  %p88_p11 = por %p3145_p4, %p86_p3 }
  0x42   : > { %p77_p6 = scmp.eq.s32.totalorder %s74_s23, 0  ;;  %p2571_p9 = por %p3169_p8, %p86_p3 }
  0x43   : > { %p3144_p13 = scmp.lt.s32.totalorder %s2378_s17, 2  ;;  %s343_s26 = sand.u32 1, %s2366_s14  }
  0x44   : > { %s3170_s30 = scalar_select %p2571_p9, 1, 0 }
  0x45   : > { %s2579_s27 = scalar_select %p77_p6, %s2366_s14, %s79_s22  }
  0x46   : > { %3171 = sst [smem:[#allocation24_spill]] %s3170_s30  ;;  %s1821_s29 = sshll.u32 %s2374_s16, 6 }
  0x47   : > { %3172 = sst [smem:[#allocation25_spill]] %s2579_s27  ;;  %s1753_s25 = sshll.u32 %s343_s26, 2 }
  0x48   : > { %s3173_s1 = sld [smem:[#allocation27_spill]]  ;;  %s347_s12 = scalar_lea.vmem [#allocation4], %s1753_s25 }
  0x49   : > { %s355_s23 = sshll.u32 %s347_s12, 4  ;;  %p2590_p0 = pnand %p3144_p13, %p88_p11  ;;  %s2594_s23 = int_to_ptr.vmem [resolvable:$true] %s355_s23 }
  0x4a   : > { %s2596_s22 = scalar_lea.sflag [#allocation5], %s343_s26 }
  0x4b   : > { %p2144_p5 = pneg %p2590_p0 }
  0x4e   : > { %s2586_s7 = scalar_lea.hbm %s3173_s1, %s1821_s29  ;;  %s2147_s9 = scalar_lea.hbm %s3173_s1, 128 }
  0x4f   : > { %s2142_s19 = scalar_lea.hbm %s2586_s7, 64  ;;  %p2148_p12 = scmp.lt.u32.totalorder %s2586_s7, %s3173_s1 }
  0x50   : > { %p2143_p2 = scmp.ne.s32.totalorder %s2586_s7, %s2142_s19  ;;  %p2149_p1 = scmp.lt.u32.totalorder %s2147_s9, %s2142_s19 }
  0x51   : > { %p2151_p6 = scmp.lt.u32.totalorder %s2142_s19, %s2586_s7 }
  0x52   : > { %p2145_p7 = pnand %p2144_p5, %p2143_p2  ;;  %p2150_p3 = por %p2149_p1, %p2148_p12 }
  0x54   : > { %p2146_p10 = pneg %p2145_p7  ;;  %p2152_p8 = por %p2151_p6, %p2150_p3 }
  0x56   : > { %p2153_p11 = pnand %p2152_p8, %p2146_p10 }
  0x58   : > { %2156 = shalt.err (!%p2153_p11)
}
  0x59   : > { %s2157_s26 = scalar_lea.vmem %s2594_s23, 64  ;;  %s2383_s29 = smov [#allocation4]  }
  0x5a   : > { %p2158_p2 = scmp.ne.s32.totalorder %s2594_s23, %s2157_s26  ;;  %s2162_s25 = sshll.u32 %s2383_s29, 4  ;;  %s2163_s25 = int_to_ptr.vmem [resolvable:$false] %s2162_s25 }
  0x5b   : > { %s2164_s27 = scalar_lea.vmem %s2163_s25, 128  ;;  %p2165_p4 = scmp.lt.s32.totalorder %s2594_s23, %s2163_s25 }
  0x5c   : > { %p2160_p7 = pnand %p2158_p2, %p2144_p5  ;;  %p2166_p12 = scmp.lt.s32.totalorder %s2164_s27, %s2157_s26 }
  0x5e   : > { %p2161_p13 = pneg %p2160_p7  ;;  %p2167_p1 = por %p2166_p12, %p2165_p4 }
  0x60   : > { %p2168_p3 = pnand %p2167_p1, %p2161_p13 }
  0x62   : > { %2171 = shalt.err (!%p2168_p3)
}
  0x63   : > { %s3149_s19 = smov 16   ;;  %s2385_s9 = smov 1  }
  0x64   : > { %1936 = dma.hbm_to_vmem [thread:$0]  (!%p2590_p0), %s2586_s7, 64, %s2594_s23, %s2596_s22, %s3149_s19, %s3149_s19, %s2385_s9  }
  0x65   : > { %s102_s12 = ssub.s32 1, %s2374_s16  ;;  %s103_s26 = ssub.s32 1, %s3215_s28 }
  0x66   : > { %s104_s29 = ssub.s32 %s102_s12, %s103_s26  ;;  %s109_s25 = sadd.s32 1, %s2354_s11 }
  0x67   : > { %p107_p4 = scmp.eq.s32.totalorder %s104_s29, 0  ;;  %p116_p13 = scmp.ne.s32.totalorder %s2354_s11, %s2350_s10 }
  0x68   : > { %s365_s27 = sand.u32 1, %s2378_s17   ;;  %s367_s1 = sand.u32 1, %s2354_s11  }
  0x69   : > { %s2635_s14 = scalar_select %p107_p4, %s2354_s11, %s109_s25  }
  0x6a   : > { %p3175_p5 = scmp.eq.s32.totalorder %s2378_s17, 0  ;;  %p3176_p6 = scmp.eq.s32.totalorder %s2493_s18, 1 }
  0x6b   : > { %s1756_s30 = sshll.u32 %s367_s1, 2  ;;  %s1822_s7 = sshll.u32 %s102_s12, 6 }
  0x6c   : > { %p118_p10 = por %p116_p13, %p3175_p5  ;;  %p2641_p8 = por %p3176_p6, %p116_p13 }
  0x6d   : > { %s2648_s26 = scalar_lea.hbm %s3126_s2, %s1822_s7  ;;  %s369_s29 = scalar_lea.vmem [#allocation7], %s1756_s30 }
  0x6e   : > { %s378_s25 = sshll.u32 %s369_s29, 4  ;;  %p3178_p0 = scmp.lt.s32.totalorder %s2378_s17, 2  ;;  %s2650_s25 = int_to_ptr.vmem [resolvable:$true] %s378_s25 }
  0x6f   : > { %s2658_s1 = scalar_lea.sflag [#allocation8], %s365_s27  ;;  %s2172_s12 = scalar_lea.hbm %s2648_s26, 64 }
  0x70   : > { %p2654_p11 = pnand %p3178_p0, %p118_p10  ;;  %p2173_p2 = scmp.ne.s32.totalorder %s2648_s26, %s2172_s12 }
  0x71   : > { %s2177_s23 = scalar_lea.hbm %s3126_s2, 128  ;;  %p2178_p3 = scmp.lt.u32.totalorder %s2648_s26, %s3126_s2 }
  0x72   : > { %p2174_p7 = pneg %p2654_p11  ;;  %p2179_p4 = scmp.lt.u32.totalorder %s2177_s23, %s2172_s12 }
  0x73   : > { %p2181_p5 = scmp.lt.u32.totalorder %s2172_s12, %s2648_s26 }
  0x74   : > { %p2175_p12 = pnand %p2174_p7, %p2173_p2  ;;  %p2180_p13 = por %p2179_p4, %p2178_p3 }
  0x76   : > { %p2176_p1 = pneg %p2175_p12  ;;  %p2182_p10 = por %p2181_p5, %p2180_p13 }
  0x78   : > { %p2183_p6 = pnand %p2182_p10, %p2176_p1 }
  0x7a   : > { %2186 = shalt.err (!%p2183_p6)
}
  0x7b   : > { %s2187_s27 = scalar_lea.vmem %s2650_s25, 64  ;;  %s2386_s30 = smov [#allocation7]  }
  0x7c   : > { %p2188_p0 = scmp.ne.s32.totalorder %s2650_s25, %s2187_s27  ;;  %s2192_s7 = sshll.u32 %s2386_s30, 4  ;;  %s2193_s7 = int_to_ptr.vmem [resolvable:$false] %s2192_s7 }
  0x7d   : > { %s2194_s22 = scalar_lea.vmem %s2193_s7, 128  ;;  %p2195_p9 = scmp.lt.s32.totalorder %s2650_s25, %s2193_s7 }
  0x7e   : > { %p2190_p2 = pnand %p2188_p0, %p2174_p7  ;;  %p2196_p3 = scmp.lt.s32.totalorder %s2194_s22, %s2187_s27 }
  0x80   : > { %p2191_p12 = pneg %p2190_p2  ;;  %p2197_p4 = por %p2196_p3, %p2195_p9 }
  0x82   : > { %p2198_p13 = pnand %p2197_p4, %p2191_p12 }
  0x84   : > { %2201 = shalt.err (!%p2198_p13)
}
  0x85   : > { %s3180_s12 = smov 16   ;;  %p3181_p7 = scmp.ne.s32.totalorder %s3164_s24, 0 }
  0x86   : > { %1939 = dma.hbm_to_vmem [thread:$0]  (!%p2654_p11), %s2648_s26, 64, %s2650_s25, %s2658_s1, %s3180_s12, %s3180_s12, %s2385_s9  }
  0x87   : > { %390 = sbr.rel (%p3181_p7) target bundleno = 3072 (0xc00), region = 48  ;;  %s2692_s23 = sand.u32 (!%p3181_p7), 1, %s2362_s13  }
  0x88   : > { %s1760_s29 = sshll.u32 (!%p3181_p7), %s2692_s23, 2  ;;  %s393_s27 = scalar_lea.sflag (!%p3181_p7), [#allocation5], %s2692_s23 }
  0x89   : > { %s2696_s30 = scalar_lea.vmem (!%p3181_p7), [#allocation4], %s1760_s29  ;;  %p3182_p9 = scmp.ne.s32.totalorder (!%p3181_p7), %s3158_s20, 0 }
  0x8e   : > { %2321 = dma.done.wait (%p3182_p9), %s393_s27, 64  }
  0x8f   : > { %2323 = vsyncadd (%p3182_p9), %s393_s27, 4294967232  ;;  %s401_s24 = sand.u32 1, %s2493_s18   ;;  %s403_s19 = sand.u32 1, %s2350_s10  }
  0x90   : > { %s1761_s9 = sshll.u32 %s403_s19, 2  ;;  %s402_s26 = scalar_lea.sflag [#allocation8], %s401_s24 }
  0x91   : > { %s2706_s25 = scalar_lea.vmem [#allocation7], %s1761_s9  ;;  %p3183_p11 = scmp.ne.s32.totalorder %s3159_s21, 0 }
  0x93   : > { %2325 = dma.done.wait (%p3183_p11), %s402_s26, 64  }
  0x94   : > { %2327 = vsyncadd (%p3183_p11), %s402_s26, 4294967232  ;;  %p3184_p1 = scmp.eq.s32.totalorder %s2493_s18, 0 }
  0x96   : > { %2329 = dma.done.wait (%p3184_p1), [#allocation8], 256   ;;  %p3185_p5 = pmov %p3184_p1 }
  0x97   : > { %s1763_s20 = sshll.u32 %s2692_s23, 3  ;;  %s1764_s1 = sshll.u32 %s403_s19, 3 }
  0x98   : > { %2331 = vsyncadd (%p3185_p5), [#allocation8], 4294967040  ;;  %s2717_s7 = scalar_lea.vmem [#allocation10], %s1763_s20  ;;  %s2719_s22 = scalar_lea.vmem [#allocation11], %s1764_s1 }
  0x99   : > { %p1765_p10 = scmp.ne.s32.totalorder %s2370_s15, 0 }
  0x9a   : > { %vm473_vm0 = vcmask (!%p1765_p10), 254976   ;;  %v2387_v0 = vmov (!%p1765_p10), 0.0  }
  0x9b   : > { %472 = sbr.rel (%p1765_p10) target bundleno = 162 (0xa2), region = 64  ;;  %474 = vst.msk [vmem:[#allocation2] sm:$0x3] (!%p1765_p10), %vm473_vm0, %v2387_v0  ;;  %475 = vst.msk [vmem:[#allocation3] sm:$0x3] (!%p1765_p10), %vm473_vm0, %v2387_v0 }
  0xa2 PF: > { %v2722_v1 = vld [vmem:[#allocation9] sm:$0xff]   ;;  %v2388_v2 = vmov 0.0   ;;  %v2732_v4 = vld [vmem:[#allocation9 + $0x8] sm:$0xff]   ;;  %vm2389_vm1 = vmmov 0   ;;  %vm528_vm2 = vcmask 261120   ;;  %v583_v12 = vlaneseq  ;;  %s2391_s1 = smov 64  }
  0xa3   : > { %1849 = vmatprep.subr.bf16.mxu0 %v2388_v2  ;;  %1857 = vmatprep.subr.bf16.mxu1 %v2388_v2  ;;  %v2729_v3 = vld [vmem:[%s3128_s4] sm:$0xff]   ;;  %v2741_v5 = vld [vmem:[%s3128_s4 + $0x8] sm:$0xff]   ;;  %v2744_v6 = vld [vmem:[#allocation2] sm:$0x3]  ;;  %v2390_v10 = vmov 1983009808  }
  0xa4   : > { %1850 = vmatpush3.bf16.msra.mxu0 %v2722_v1  ;;  %1853 = vmatprep.mubr.msk.bf16.mxu0 %vm2389_vm1, %v2388_v2  ;;  %v2748_v7 = vld [vmem:[#allocation3] sm:$0x3]  ;;  %v515_v8 = vpack.c.bf16 %v2744_v6, %v2744_v6  ;;  %v581_v11 = vunpack.c.l.s4 %v2390_v10  ;;  %v584_v14 = vshrl.u32 %v583_v12, 7  ;;  %v2775_v15 = vld [vmem:[%s3129_s5] ss:$0 sm:$0xff]  ;;  %s3186_s0 = sld [smem:[#allocation26_spill]] }
  0xa5   : > { %1858 = vmatpush3.bf16.msra.mxu1 %v2729_v3  ;;  %1851 = vmatprep.subr.bf16.mxu0 %v2388_v2  ;;  %v619_v9 = vpack.c.bf16 %v2748_v7, %v2748_v7  ;;  %v2780_v16 = vld [vmem:[%s3130_s6] ss:$0 sm:$0xff]  ;;  %v513_v30 = vld [vmem:[%s2696_s30] sm:$0x1]  ;;  %v1776_v32 = vld [vmem:[%s2706_s25 + $0x3] sm:$0x1] }
  0xa6   : > { %1859 = vmatprep.subr.bf16.mxu1 %v2388_v2  ;;  %1861 = vmatprep.mubr.msk.bf16.mxu1 %vm2389_vm1, %v2388_v2  ;;  %v582_v13 = vunpack.c.0.s8 %v581_v11  ;;  %v514_v31 = vunpack.c.l.bf16 %v513_v30  ;;  %v618_v34 = vunpack.c.l.bf16 %v1776_v32  ;;  %s2802_s29 = sshll.u32 %s2370_s15, 2  ;;  %s500_s27 = ssub.s32 1, %s2370_s15  ;;  %v2392_v50 = vmov 0  }
  0xa7   : > { %2046 = vset.pattern.permute.xlu1 %v2392_v50  ;;  %v505_v51 = vstv %s2802_s29  ;;  %2040 = vset.pattern.permute.xlu0 %v2392_v50  ;;  %s2808_s19 = sshll.u32 %s500_s27, 2  ;;  %s2393_s26 = smov 32   ;;  %vm736_vm5 = vcmask 254976  }
  0xa8   : > { %1852 = vmatpush3.bf16.msra.mxu0 %v2732_v4  ;;  %v2782_v17 = vsub.s32 %v582_v13, %v584_v14  ;;  %s504_s9 = sadd.s32 3, %s2808_s19  ;;  %s2394_s20 = smov 96  }
  0xa9   : > { %1860 = vmatpush3.bf16.msra.mxu1 %v2741_v5  ;;  %1865 = vmatprep.subr.bf16.mxu0 %v2388_v2  ;;  %v509_v52 = vstv %s504_s9  ;;  %s773_s21 = sadd.s32 1, %s2802_s29  ;;  %s774_s12 = sadd.s32 2, %s2808_s19 }
  0xaa   : > { %1873 = vmatprep.subr.bf16.mxu1 %v2388_v2  ;;  %v610_v48 = vrot.slane %v2744_v6, %v2782_v17  ;;  %v2799_v49 = vld [vmem:[%s3186_s0] sm:$0x3]  ;;  %v713_v53 = vrot.slane %v2748_v7, %v2782_v17  ;;  %s1019_s9 = sadd.s32 2, %s2802_s29  ;;  %p1810_p6 = scmp.ne.s32.totalorder %s2370_s15, 1 }
  0xab   : > { %1854 = vmatmul.mubr.msk.bf16.vlgmr.msra.gmra.mrb[0].mxu0 %vm528_vm2, %v515_v8  ;;  %vm506_vm3 = vcmp.lt.s32.totalorder %v505_v51, %v2799_v49  ;;  %vm510_vm4 = vcmp.lt.s32.totalorder %v509_v52, %v2799_v49  ;;  %v1784_v51 = vld [vmem:[%s2696_s30 + $0x1] sm:$0x1] }
  0xac   : > { %1862 = vmatmul.mubr.msk.bf16.vlgmr.msra.gmra.mrb[0].mxu1 %vm528_vm2, %v619_v9  ;;  %1866 = vmatpush3.bf16.msra.mxu0 %v2722_v1  ;;  %v1770_v54 = vsel %vm506_vm3, 1.0, %v2388_v2  ;;  %v1771_v55 = vsel %vm510_vm4, 1.0, %v2388_v2  ;;  %v785_v52 = vunpack.c.l.bf16 %v1784_v51 }
  0xad   : > { %1867 = vmatprep.subr.bf16.mxu0 %v2388_v2  ;;  %1874 = vmatpush3.bf16.msra.mxu1 %v2729_v3  ;;  %v2041_v56 = vpack.i.bf16 %v1771_v55, %v1770_v54  ;;  %v757_v57 = vsub.f32 1.0, %v1770_v54  ;;  %v765_v58 = vsub.f32 1.0, %v1771_v55 }
  0xae   : > { %1869 = vmatprep.mubr.msk.bf16.mxu0 %vm2389_vm1, %v2388_v2  ;;  %1875 = vmatprep.subr.bf16.mxu1 %v2388_v2 }
  0xaf   : > { %1877 = vmatprep.mubr.msk.bf16.mxu1 %vm2389_vm1, %v2388_v2 }
  0xb0   : > { %1868 = vmatpush3.bf16.msra.mxu0 %v2732_v4 }
  0xb1   : > { %1876 = vmatpush3.bf16.msra.mxu1 %v2741_v5  ;;  %1881 = vmatprep.subr.bf16.mxu0 %v2388_v2 }
  0xb2   : > { %1889 = vmatprep.subr.bf16.mxu1 %v2388_v2 }
 0x17e   : > { %v566_v18 = vpop.f32.mrb[0].mxu0 }
 0x17f   : > { %v567_v19 = vadd.f32 %v2775_v15, %v566_v18  ;;  %v1855_v20 = vpop.f32.mrb[1].mxu0  ;;  %v669_v21 = vpop.f32.mrb[0].mxu1 }
 0x180   : > { %v670_v22 = vadd.f32 %v2780_v16, %v669_v21  ;;  %v569_v23 = vpop.f32.mrb[2].mxu0  ;;  %v1863_v24 = vpop.f32.mrb[1].mxu1 }
 0x181   : > { %v1856_v25 = vpop.f32.mrb[3].mxu0  ;;  %v672_v26 = vpop.f32.mrb[2].mxu1  ;;  %v586_v27 = vrot.slane %v567_v19, %v2782_v17  ;;  %v572_v33 = vadd.f32 %v567_v19, %v514_v31 }
 0x182   : > { %v1864_v28 = vpop.f32.mrb[3].mxu1  ;;  %v689_v29 = vrot.slane %v670_v22, %v2782_v17  ;;  %v675_v36 = vadd.f32 %v670_v22, %v618_v34 }
 0x183   : > { %587 = vrot.lane.b32.xlu0 %v586_v27, %s2391_s1  ;;  %v1775_v35 = vmul.f32 -1.442695, %v572_v33 }
 0x184   : > { %v1780_v37 = vmul.f32 -1.442695, %v675_v36 }
 0x185   : > { %2066 = vpow2.f32 %v1775_v35 }
 0x186   : > { %2068 = vpow2.f32 %v1780_v37 }
 0x187   : > { %690 = vrot.lane.b32.xlu0 %v689_v29, %s2391_s1 }
 0x18f   : > { %v2067_v38 = vpop.eup %2066 }
 0x190   : > { %v576_v39 = vadd.f32 1.0, %v2067_v38  ;;  %v2069_v40 = vpop.eup %2068 }
 0x191   : > { %v679_v41 = vadd.f32 1.0, %v2069_v40 }
 0x192   : > { %2070 = vrcp.f32 %v576_v39 }
 0x193   : > { %2072 = vrcp.f32 %v679_v41 }
 0x19c   : > { %v2071_v42 = vpop.eup %2070 }
 0x19d   : > { %v2073_v45 = vpop.eup %2072  ;;  %v597_v9 = vsub.f32 1.0, %v2071_v42 }
 0x19e   : > { %v700_v18 = vsub.f32 1.0, %v2073_v45 }
 0x1f5   : > { %v588_v43 = vpop.permute.xlu0 %587 }
 0x1f6   : > { %v590_v44 = vmul.f32 %v2071_v42, %v588_v43 }
 0x1f8   : > { %592 = vrot.lane.b32.xlu1 %v590_v44, %s2391_s1 }
 0x1f9   : > { %v691_v46 = vpop.permute.xlu0 %690 }
 0x1fa   : > { %v693_v47 = vmul.f32 %v2073_v45, %v691_v46 }
 0x1fc   : > { %695 = vrot.lane.b32.xlu1 %v693_v47, %s2391_s1 }
 0x200   : > { %611 = vrot.lane.b32.xlu1 %v610_v48, %s2393_s26 }
 0x204   : > { %714 = vrot.lane.b32.xlu1 %v713_v53, %s2393_s26  ;;  %v1787_v53 = vld [vmem:[%s2706_s25 + $0x2] sm:$0x1] }
 0x205   : > { %v876_v55 = vunpack.c.l.bf16 %v1787_v53 }
 0x208   : > { %760 = vperm.xlu1 %2046, %v757_v57  }
 0x20c   : > { %768 = vperm.xlu1 %2046, %v765_v58  }
 0x26a   : > { %v593_v59 = vpop.permute.xlu1 %592 }
 0x26b   : > { %v595_v60 = vadd.f32 %v593_v59, %v514_v31 }
 0x26d   : > { %2074 = vtanh.f32 %v595_v60 }
 0x26e   : > { %v696_v61 = vpop.permute.xlu1 %695 }
 0x26f   : > { %v698_v62 = vadd.f32 %v696_v61, %v618_v34 }
 0x271   : > { %2076 = vtanh.f32 %v698_v62 }
 0x272   : > { %v612_v8 = vpop.permute.xlu1 %611 }
 0x273   : > { %v614_v11 = vmul.f32 %v2071_v42, %v612_v8 }
 0x276   : > { %v715_v13 = vpop.permute.xlu1 %714 }
 0x277   : > { %v2075_v63 = vpop.eup %2074  ;;  %v717_v20 = vmul.f32 %v2073_v45, %v715_v13 }
 0x278   : > { %599 = vrot.lane.b32.xlu0 %v2075_v63, %s2394_s20 }
 0x27b   : > { %v2077_v0 = vpop.eup %2076 }
 0x27c   : > { %702 = vrot.lane.b32.xlu0 %v2077_v0, %s2394_s20 }
 0x280   : > { %2042 = vperm.xlu0 %2040, %v2041_v56  }
 0x287   : > { %v761_v25 = vpop.permute.xlu1 %760 }
 0x288   : > { %v763_v30 = vmul.f32 %v761_v25, %v2744_v6 }
 0x28b   : > { %v769_v28 = vpop.permute.xlu1 %768 }
 0x28c   : > { %v771_v35 = vmul.f32 %v769_v28, %v2748_v7 }
 0x2ea   : > { %v600_v10 = vpop.permute.xlu0 %599 }
 0x2eb   : > { %v602_v12 = vmul.f32 %v600_v10, %v597_v9 }
 0x2ed   : > { %v615_v14 = vadd.f32 %v614_v11, %v602_v12  ;;  %v775_v12 = vstv %s773_s21  ;;  %s1020_s21 = sadd.s32 1, %s2808_s19 }
 0x2ee   : > { %v703_v19 = vpop.permute.xlu0 %702  ;;  %vm776_vm6 = vcmp.lt.s32.totalorder %v775_v12, %v2799_v49 }
 0x2ef   : > { %v705_v21 = vmul.f32 %v703_v19, %v700_v18  ;;  %v731_v22 = vrot.slane %v615_v14, %v2782_v17  ;;  %v1782_v14 = vsel %vm776_vm6, 1.0, %v2388_v2 }
 0x2f0   : > { %v1003_v19 = vsub.f32 1.0, %v1782_v14 }
 0x2f1   : > { %v718_v23 = vadd.f32 %v717_v20, %v705_v21  ;;  %732 = vrot.lane.b32.xlu0 %v731_v22, %s2394_s20 }
 0x2f3   : > { %v750_v24 = vrot.slane %v718_v23, %v2782_v17 }
 0x2f5   : > { %751 = vrot.lane.b32.xlu1 %v750_v24, %s2394_s20  ;;  %v779_v24 = vstv %s774_s12 }
 0x2f6   : > { %vm780_vm7 = vcmp.lt.s32.totalorder %v779_v24, %v2799_v49 }
 0x2ff   : > { %v2043_v26 = vpop.permute.xlu0 %2042 }
 0x300   : > { %v2044_v27 = vunpack.i.l.bf16 %v2043_v26  ;;  %v2045_v32 = vunpack.i.h.bf16 %v2043_v26  ;;  %v1783_v26 = vsel %vm780_vm7, 1.0, %v2388_v2 }
 0x301   : > { %v2047_v28 = vpack.i.bf16 %v1783_v26, %v1782_v14 }
 0x363   : > { %v733_v29 = vpop.permute.xlu0 %732 }
 0x364   : > { %v735_v31 = vmul.f32 %v2044_v27, %v733_v29  ;;  %v1011_v29 = vsub.f32 1.0, %v1783_v26 }
 0x366   : > { %737 = vst.msk [vmem:[%s2717_s7] sm:$0x3] %vm736_vm5, %v735_v31  ;;  %v2828_v33 = vadd.f32 %v763_v30, %v735_v31 }
 0x367   : > { %v752_v34 = vpop.permute.xlu1 %751 }
 0x368   : > { %v786_v36 = vpack.c.bf16 %v2828_v33, %v2828_v33  ;;  %v754_v37 = vmul.f32 %v2045_v32, %v752_v34  ;;  %v868_v13 = vrot.slane %v2828_v33, %v2782_v17 }
 0x36a   : > { %1781 = vst.msk [vmem:[%s2719_s22 + $0x6] sm:$0x3] %vm736_vm5, %v754_v37  ;;  %v2835_v38 = vadd.f32 %v771_v35, %v754_v37  ;;  %1870 = vmatmul.mubr.msk.bf16.vlgmr.msra.gmra.mrb[4].mxu0 %vm528_vm2, %v786_v36 }
 0x36b   : > { %1882 = vmatpush3.bf16.msra.mxu0 %v2722_v1  ;;  %1885 = vmatprep.mubr.msk.bf16.mxu0 %vm2389_vm1, %v2388_v2 }
 0x36c   : > { %v877_v6 = vpack.c.bf16 %v2835_v38, %v2835_v38  ;;  %1883 = vmatprep.subr.bf16.mxu0 %v2388_v2  ;;  %v959_v18 = vrot.slane %v2835_v38, %v2782_v17 }
 0x36e   : > { %1878 = vmatmul.mubr.msk.bf16.vlgmr.msra.gmra.mrb[4].mxu1 %vm528_vm2, %v877_v6 }
 0x36f   : > { %1884 = vmatpush3.bf16.msra.mxu0 %v2732_v4  ;;  %1890 = vmatpush3.bf16.msra.mxu1 %v2729_v3 }
 0x370   : > { %1891 = vmatprep.subr.bf16.mxu1 %v2388_v2  ;;  %1893 = vmatprep.mubr.msk.bf16.mxu1 %vm2389_vm1, %v2388_v2 }
 0x371   : > { %1897 = vmatprep.subr.bf16.mxu0 %v2388_v2 }
 0x373   : > { %1892 = vmatpush3.bf16.msra.mxu1 %v2741_v5 }
 0x374   : > { %1905 = vmatprep.subr.bf16.mxu1 %v2388_v2 }
 0x43d   : > { %v824_v7 = vpop.f32.mrb[4].mxu0 }
 0x43e   : > { %v825_v39 = vadd.f32 %v2775_v15, %v824_v7  ;;  %v1871_v40 = vpop.f32.mrb[5].mxu0 }
 0x43f   : > { %v827_v41 = vpop.f32.mrb[6].mxu0 }
 0x440   : > { %v844_v42 = vrot.slane %v825_v39, %v2782_v17  ;;  %v1872_v43 = vpop.f32.mrb[7].mxu0  ;;  %v830_v54 = vadd.f32 %v825_v39, %v785_v52 }
 0x441   : > { %v915_v44 = vpop.f32.mrb[4].mxu1 }
 0x442   : > { %v916_v45 = vadd.f32 %v2780_v16, %v915_v44  ;;  %v1879_v46 = vpop.f32.mrb[5].mxu1  ;;  %845 = vrot.lane.b32.xlu0 %v844_v42, %s2391_s1  ;;  %v1786_v56 = vmul.f32 -1.442695, %v830_v54 }
 0x443   : > { %v918_v47 = vpop.f32.mrb[6].mxu1 }
 0x444   : > { %v935_v48 = vrot.slane %v916_v45, %v2782_v17  ;;  %v1880_v50 = vpop.f32.mrb[7].mxu1  ;;  %v921_v57 = vadd.f32 %v916_v45, %v876_v55  ;;  %2078 = vpow2.f32 %v1786_v56 }
 0x446   : > { %936 = vrot.lane.b32.xlu1 %v935_v48, %s2391_s1  ;;  %v1789_v58 = vmul.f32 -1.442695, %v921_v57 }
 0x448   : > { %2080 = vpow2.f32 %v1789_v58 }
 0x44e   : > { %v2079_v59 = vpop.eup %2078 }
 0x44f   : > { %v834_v60 = vadd.f32 1.0, %v2079_v59 }
 0x451   : > { %2082 = vrcp.f32 %v834_v60 }
 0x452   : > { %v2081_v61 = vpop.eup %2080 }
 0x453   : > { %v925_v62 = vadd.f32 1.0, %v2081_v61 }
 0x455   : > { %2084 = vrcp.f32 %v925_v62 }
 0x45b   : > { %v2083_v63 = vpop.eup %2082 }
 0x45c   : > { %v855_v31 = vsub.f32 1.0, %v2083_v63 }
 0x45f   : > { %v2085_v9 = vpop.eup %2084 }
 0x460   : > { %v946_v6 = vsub.f32 1.0, %v2085_v9 }
 0x4b4   : > { %v846_v0 = vpop.permute.xlu0 %845 }
 0x4b5   : > { %v848_v8 = vmul.f32 %v2083_v63, %v846_v0 }
 0x4b7   : > { %850 = vrot.lane.b32.xlu0 %v848_v8, %s2391_s1 }
 0x4b8   : > { %v937_v10 = vpop.permute.xlu1 %936 }
 0x4b9   : > { %v939_v11 = vmul.f32 %v2085_v9, %v937_v10 }
 0x4bb   : > { %941 = vrot.lane.b32.xlu1 %v939_v11, %s2391_s1  ;;  %v1797_v11 = vld [vmem:[%s2706_s25 + $0x1] sm:$0x1] }
 0x4bf   : > { %869 = vrot.lane.b32.xlu1 %v868_v13, %s2393_s26  ;;  %v1122_v13 = vunpack.c.l.bf16 %v1797_v11 }
 0x4c3   : > { %960 = vrot.lane.b32.xlu1 %v959_v18, %s2393_s26 }
 0x4c7   : > { %1006 = vperm.xlu1 %2046, %v1003_v19  }
 0x529   : > { %v851_v20 = vpop.permute.xlu0 %850 }
 0x52a   : > { %v853_v21 = vadd.f32 %v851_v20, %v785_v52 }
 0x52c   : > { %2086 = vtanh.f32 %v853_v21 }
 0x52d   : > { %v942_v22 = vpop.permute.xlu1 %941 }
 0x52e   : > { %v944_v23 = vadd.f32 %v942_v22, %v876_v55 }
 0x530   : > { %2088 = vtanh.f32 %v944_v23 }
 0x531   : > { %v870_v30 = vpop.permute.xlu1 %869 }
 0x532   : > { %v872_v34 = vmul.f32 %v2083_v63, %v870_v30  ;;  %v1021_v30 = vstv %s1019_s9 }
 0x533   : > { %vm1022_vm8 = vcmp.lt.s32.totalorder %v1021_v30, %v2799_v49 }
 0x535   : > { %v961_v36 = vpop.permute.xlu1 %960 }
 0x536   : > { %v2087_v25 = vpop.eup %2086  ;;  %v963_v39 = vmul.f32 %v2085_v9, %v961_v36 }
 0x537   : > { %857 = vrot.lane.b32.xlu0 %v2087_v25, %s2394_s20 }
 0x53a   : > { %v2089_v27 = vpop.eup %2088 }
 0x53b   : > { %948 = vrot.lane.b32.xlu0 %v2089_v27, %s2394_s20 }
 0x53f   : > { %2048 = vperm.xlu0 %2040, %v2047_v28  }
 0x543   : > { %1014 = vperm.xlu0 %2040, %v1011_v29  }
 0x546   : > { %v1007_v45 = vpop.permute.xlu1 %1006 }
 0x547   : > { %v1009_v50 = vmul.f32 %v1007_v45, %v2828_v33 }
 0x5a9   : > { %v858_v32 = vpop.permute.xlu0 %857 }
 0x5aa   : > { %v860_v35 = vmul.f32 %v858_v32, %v855_v31  ;;  %v1792_v32 = vsel %vm1022_vm8, 1.0, %v2388_v2 }
 0x5ac   : > { %v873_v37 = vadd.f32 %v872_v34, %v860_v35  ;;  %v1249_v35 = vsub.f32 1.0, %v1792_v32 }
 0x5ad   : > { %v949_v7 = vpop.permute.xlu0 %948 }
 0x5ae   : > { %v951_v40 = vmul.f32 %v949_v7, %v946_v6  ;;  %v977_v41 = vrot.slane %v873_v37, %v2782_v17 }
 0x5b0   : > { %v964_v42 = vadd.f32 %v963_v39, %v951_v40  ;;  %978 = vrot.lane.b32.xlu1 %v977_v41, %s2394_s20  ;;  %v1025_v39 = vstv %s1020_s21 }
 0x5b1   : > { %vm1026_vm9 = vcmp.lt.s32.totalorder %v1025_v39, %v2799_v49 }
 0x5b2   : > { %v996_v43 = vrot.slane %v964_v42, %v2782_v17  ;;  %v1793_v41 = vsel %vm1026_vm9, 1.0, %v2388_v2 }
 0x5b4   : > { %997 = vrot.lane.b32.xlu0 %v996_v43, %s2394_s20  ;;  %v2052_v43 = vpack.i.bf16 %v1793_v41, %v1792_v32 }
 0x5be   : > { %v2049_v44 = vpop.permute.xlu0 %2048 }
 0x5bf   : > { %v2050_v46 = vunpack.i.l.bf16 %v2049_v44  ;;  %v2051_v52 = vunpack.i.h.bf16 %v2049_v44  ;;  %v1257_v44 = vsub.f32 1.0, %v1793_v41 }
 0x5c2   : > { %v1015_v47 = vpop.permute.xlu0 %1014 }
 0x5c3   : > { %v1017_v55 = vmul.f32 %v1015_v47, %v2835_v38 }
 0x622   : > { %v979_v48 = vpop.permute.xlu1 %978 }
 0x623   : > { %v981_v51 = vmul.f32 %v2050_v46, %v979_v48 }
 0x625   : > { %1790 = vst.msk [vmem:[%s2717_s7 + $0x2] sm:$0x3] %vm736_vm5, %v981_v51  ;;  %v2884_v53 = vadd.f32 %v1009_v50, %v981_v51 }
 0x626   : > { %v998_v54 = vpop.permute.xlu0 %997 }
 0x627   : > { %v1032_v56 = vpack.c.bf16 %v2884_v53, %v2884_v53  ;;  %v1000_v57 = vmul.f32 %v2051_v52, %v998_v54  ;;  %v1114_v31 = vrot.slane %v2884_v53, %v2782_v17 }
 0x629   : > { %1791 = vst.msk [vmem:[%s2719_s22 + $0x4] sm:$0x3] %vm736_vm5, %v1000_v57  ;;  %v2891_v58 = vadd.f32 %v1017_v55, %v1000_v57  ;;  %1886 = vmatmul.mubr.msk.bf16.vlgmr.msra.gmra.mrb[8].mxu0 %vm528_vm2, %v1032_v56 }
 0x62a   : > { %1898 = vmatpush3.bf16.msra.mxu0 %v2722_v1  ;;  %1901 = vmatprep.mubr.msk.bf16.mxu0 %vm2389_vm1, %v2388_v2 }
 0x62b   : > { %v1123_v33 = vpack.c.bf16 %v2891_v58, %v2891_v58  ;;  %1899 = vmatprep.subr.bf16.mxu0 %v2388_v2  ;;  %v1205_v34 = vrot.slane %v2891_v58, %v2782_v17 }
 0x62d   : > { %1894 = vmatmul.mubr.msk.bf16.vlgmr.msra.gmra.mrb[8].mxu1 %vm528_vm2, %v1123_v33 }
 0x62e   : > { %1900 = vmatpush3.bf16.msra.mxu0 %v2732_v4  ;;  %1906 = vmatpush3.bf16.msra.mxu1 %v2729_v3 }
 0x62f   : > { %1907 = vmatprep.subr.bf16.mxu1 %v2388_v2  ;;  %1909 = vmatprep.mubr.msk.bf16.mxu1 %vm2389_vm1, %v2388_v2 }
 0x632   : > { %1908 = vmatpush3.bf16.msra.mxu1 %v2741_v5  ;;  %v1794_v5 = vld [vmem:[%s2696_s30 + $0x2] sm:$0x1] }
 0x633   : > { %v1031_v10 = vunpack.c.l.bf16 %v1794_v5 }
 0x6fc   : > { %v1070_v1 = vpop.f32.mrb[8].mxu0 }
 0x6fd   : > { %v1071_v38 = vadd.f32 %v2775_v15, %v1070_v1  ;;  %v1887_v59 = vpop.f32.mrb[9].mxu0 }
 0x6fe   : > { %v1073_v60 = vpop.f32.mrb[10].mxu0 }
 0x6ff   : > { %v1090_v61 = vrot.slane %v1071_v38, %v2782_v17  ;;  %v1888_v62 = vpop.f32.mrb[11].mxu0  ;;  %v1076_v12 = vadd.f32 %v1071_v38, %v1031_v10 }
 0x700   : > { %v1161_v4 = vpop.f32.mrb[8].mxu1 }
 0x701   : > { %v1162_v3 = vadd.f32 %v2780_v16, %v1161_v4  ;;  %v1895_v63 = vpop.f32.mrb[9].mxu1  ;;  %1091 = vrot.lane.b32.xlu1 %v1090_v61, %s2391_s1  ;;  %v1796_v14 = vmul.f32 -1.442695, %v1076_v12 }
 0x702   : > { %v1164_v0 = vpop.f32.mrb[10].mxu1 }
 0x703   : > { %v1181_v8 = vrot.slane %v1162_v3, %v2782_v17  ;;  %v1896_v9 = vpop.f32.mrb[11].mxu1  ;;  %v1167_v18 = vadd.f32 %v1162_v3, %v1122_v13  ;;  %2090 = vpow2.f32 %v1796_v14 }
 0x705   : > { %1182 = vrot.lane.b32.xlu0 %v1181_v8, %s2391_s1  ;;  %v1799_v19 = vmul.f32 -1.442695, %v1167_v18 }
 0x707   : > { %2092 = vpow2.f32 %v1799_v19 }
 0x70d   : > { %v2091_v20 = vpop.eup %2090 }
 0x70e   : > { %v1080_v21 = vadd.f32 1.0, %v2091_v20 }
 0x710   : > { %2094 = vrcp.f32 %v1080_v21 }
 0x711   : > { %v2093_v22 = vpop.eup %2092 }
 0x712   : > { %v1171_v23 = vadd.f32 1.0, %v2093_v22 }
 0x714   : > { %2096 = vrcp.f32 %v1171_v23 }
 0x71a   : > { %v2095_v24 = vpop.eup %2094 }
 0x71b   : > { %v1101_v46 = vsub.f32 1.0, %v2095_v24 }
 0x71e   : > { %v2097_v27 = vpop.eup %2096 }
 0x71f   : > { %v1192_v54 = vsub.f32 1.0, %v2097_v27 }
 0x773   : > { %v1092_v25 = vpop.permute.xlu1 %1091 }
 0x774   : > { %v1094_v26 = vmul.f32 %v2095_v24, %v1092_v25 }
 0x776   : > { %1096 = vrot.lane.b32.xlu1 %v1094_v26, %s2391_s1 }
 0x777   : > { %v1183_v28 = vpop.permute.xlu0 %1182 }
 0x778   : > { %v1185_v29 = vmul.f32 %v2097_v27, %v1183_v28 }
 0x77a   : > { %1187 = vrot.lane.b32.xlu0 %v1185_v29, %s2391_s1 }
 0x77e   : > { %1115 = vrot.lane.b32.xlu0 %v1114_v31, %s2393_s26 }
 0x782   : > { %1206 = vrot.lane.b32.xlu0 %v1205_v34, %s2393_s26 }
 0x786   : > { %1252 = vperm.xlu0 %2040, %v1249_v35  }
 0x7e8   : > { %v1097_v36 = vpop.permute.xlu1 %1096 }
 0x7e9   : > { %v1099_v37 = vadd.f32 %v1097_v36, %v1031_v10 }
 0x7eb   : > { %2098 = vtanh.f32 %v1099_v37 }
 0x7ec   : > { %v1188_v6 = vpop.permute.xlu0 %1187 }
 0x7ed   : > { %v1190_v7 = vadd.f32 %v1188_v6, %v1122_v13 }
 0x7ef   : > { %2100 = vtanh.f32 %v1190_v7 }
 0x7f0   : > { %v1116_v45 = vpop.permute.xlu0 %1115 }
 0x7f1   : > { %v1118_v48 = vmul.f32 %v2095_v24, %v1116_v45 }
 0x7f4   : > { %v1207_v51 = vpop.permute.xlu0 %1206 }
 0x7f5   : > { %v2099_v40 = vpop.eup %2098  ;;  %v1209_v56 = vmul.f32 %v2097_v27, %v1207_v51  ;;  %v1804_v27 = vld [vmem:[%s2696_s30 + $0x3] sm:$0x1]  ;;  %s1265_s30 = sadd.s32 3, %s2802_s29 }
 0x7f6   : > { %1103 = vrot.lane.b32.xlu1 %v2099_v40, %s2394_s20  ;;  %v1276_v28 = vunpack.c.l.bf16 %v1804_v27 }
 0x7f9   : > { %v2101_v42 = vpop.eup %2100 }
 0x7fa   : > { %1194 = vrot.lane.b32.xlu1 %v2101_v42, %s2394_s20 }
 0x7fe   : > { %2053 = vperm.xlu1 %2046, %v2052_v43   ;;  %v1266_v43 = vstv %s1265_s30 }
 0x7ff   : > { %vm1267_vm10 = vcmp.lt.s32.totalorder %v1266_v43, %v2799_v49 }
 0x800   : > { %v1802_v45 = vsel %vm1267_vm10, 1.0, %v2388_v2 }
 0x802   : > { %1260 = vperm.xlu1 %2046, %v1257_v44  }
 0x805   : > { %v1253_v60 = vpop.permute.xlu0 %1252 }
 0x806   : > { %v1255_v3 = vmul.f32 %v1253_v60, %v2884_v53 }
 0x868   : > { %v1104_v47 = vpop.permute.xlu1 %1103 }
 0x869   : > { %v1106_v50 = vmul.f32 %v1104_v47, %v1101_v46  ;;  %v1492_v47 = vsub.f32 1.0, %v1802_v45 }
 0x86b   : > { %v1119_v52 = vadd.f32 %v1118_v48, %v1106_v50 }
 0x86c   : > { %v1195_v55 = vpop.permute.xlu1 %1194 }
 0x86d   : > { %v1197_v57 = vmul.f32 %v1195_v55, %v1192_v54  ;;  %v1223_v33 = vrot.slane %v1119_v52, %v2782_v17  ;;  %v1270_v54 = vstv %s2808_s19 }
 0x86e   : > { %vm1271_vm11 = vcmp.lt.s32.totalorder %v1270_v54, %v2799_v49 }
 0x86f   : > { %v1210_v1 = vadd.f32 %v1209_v56, %v1197_v57  ;;  %1224 = vrot.lane.b32.xlu0 %v1223_v33, %s2394_s20  ;;  %v1803_v56 = vsel %vm1271_vm11, 1.0, %v2388_v2 }
 0x870   : > { %v2057_v33 = vpack.i.bf16 %v1803_v56, %v1802_v45 }
 0x871   : > { %v1242_v38 = vrot.slane %v1210_v1, %v2782_v17  ;;  %v1500_v1 = vsub.f32 1.0, %v1803_v56 }
 0x873   : > { %1243 = vrot.lane.b32.xlu1 %v1242_v38, %s2394_s20 }
 0x87d   : > { %v2054_v59 = vpop.permute.xlu1 %2053 }
 0x87e   : > { %v2055_v61 = vunpack.i.l.bf16 %v2054_v59  ;;  %v2056_v0 = vunpack.i.h.bf16 %v2054_v59 }
 0x881   : > { %v1261_v62 = vpop.permute.xlu1 %1260 }
 0x882   : > { %v1263_v5 = vmul.f32 %v1261_v62, %v2891_v58 }
 0x8e1   : > { %v1225_v4 = vpop.permute.xlu0 %1224 }
 0x8e2   : > { %v1227_v63 = vmul.f32 %v2055_v61, %v1225_v4 }
 0x8e4   : > { %1800 = vst.msk [vmem:[%s2717_s7 + $0x4] sm:$0x3] %vm736_vm5, %v1227_v63  ;;  %v2938_v8 = vadd.f32 %v1255_v3, %v1227_v63 }
 0x8e5   : > { %v1244_v9 = vpop.permute.xlu1 %1243 }
 0x8e6   : > { %v1277_v10 = vpack.c.bf16 %v2938_v8, %v2938_v8  ;;  %v1246_v11 = vmul.f32 %v2056_v0, %v1244_v9  ;;  %v1359_v44 = vrot.slane %v2938_v8, %v2782_v17 }
 0x8e8   : > { %1801 = vst.msk [vmem:[%s2719_s22 + $0x2] sm:$0x3] %vm736_vm5, %v1246_v11  ;;  %v2945_v12 = vadd.f32 %v1263_v5, %v1246_v11  ;;  %1902 = vmatmul.mubr.msk.bf16.vlgmr.msra.gmra.mrb[12].mxu0 %vm528_vm2, %v1277_v10 }
 0x8ea   : > { %v1367_v53 = vpack.c.bf16 %v2945_v12, %v2945_v12  ;;  %v1449_v46 = vrot.slane %v2945_v12, %v2782_v17 }
 0x8ec   : > { %1910 = vmatmul.mubr.msk.bf16.vlgmr.msra.gmra.mrb[12].mxu1 %vm528_vm2, %v1367_v53 }
 0x9bb   : > { %v1315_v13 = vpop.f32.mrb[12].mxu0 }
 0x9bc   : > { %v1316_v58 = vadd.f32 %v2775_v15, %v1315_v13  ;;  %v1903_v14 = vpop.f32.mrb[13].mxu0  ;;  %v1365_v15 = vld [vmem:[%s2706_s25] sm:$0x1] }
 0x9bd   : > { %v1318_v18 = vpop.f32.mrb[14].mxu0  ;;  %v1366_v30 = vunpack.c.l.bf16 %v1365_v15 }
 0x9be   : > { %v1335_v19 = vrot.slane %v1316_v58, %v2782_v17  ;;  %v1904_v20 = vpop.f32.mrb[15].mxu0  ;;  %v1321_v29 = vadd.f32 %v1316_v58, %v1276_v28 }
 0x9bf   : > { %v1405_v21 = vpop.f32.mrb[12].mxu1 }
 0x9c0   : > { %v1406_v22 = vadd.f32 %v2780_v16, %v1405_v21  ;;  %v1911_v23 = vpop.f32.mrb[13].mxu1  ;;  %1336 = vrot.lane.b32.xlu0 %v1335_v19, %s2391_s1  ;;  %v1806_v31 = vmul.f32 -1.442695, %v1321_v29 }
 0x9c1   : > { %v1408_v24 = vpop.f32.mrb[14].mxu1 }
 0x9c2   : > { %v1425_v25 = vrot.slane %v1406_v22, %v2782_v17  ;;  %v1912_v26 = vpop.f32.mrb[15].mxu1  ;;  %v1411_v32 = vadd.f32 %v1406_v22, %v1366_v30  ;;  %2102 = vpow2.f32 %v1806_v31 }
 0x9c4   : > { %1426 = vrot.lane.b32.xlu1 %v1425_v25, %s2391_s1  ;;  %v1808_v34 = vmul.f32 -1.442695, %v1411_v32 }
 0x9c6   : > { %2104 = vpow2.f32 %v1808_v34 }
 0x9cc   : > { %v2103_v16 = vpop.eup %2102 }
 0x9cd   : > { %v1325_v35 = vadd.f32 1.0, %v2103_v16 }
 0x9cf   : > { %2106 = vrcp.f32 %v1325_v35 }
 0x9d0   : > { %v2105_v36 = vpop.eup %2104 }
 0x9d1   : > { %v1415_v37 = vadd.f32 1.0, %v2105_v36 }
 0x9d3   : > { %2108 = vrcp.f32 %v1415_v37 }
 0x9d9   : > { %v2107_v6 = vpop.eup %2106 }
 0x9da   : > { %v1346_v59 = vsub.f32 1.0, %v2107_v6 }
 0x9dd   : > { %v2109_v40 = vpop.eup %2108 }
 0x9de   : > { %v1436_v49 = vsub.f32 1.0, %v2109_v40 }
 0xa32   : > { %v1337_v7 = vpop.permute.xlu0 %1336 }
 0xa33   : > { %v1339_v39 = vmul.f32 %v2107_v6, %v1337_v7 }
 0xa35   : > { %1341 = vrot.lane.b32.xlu0 %v1339_v39, %s2391_s1 }
 0xa36   : > { %v1427_v41 = vpop.permute.xlu1 %1426 }
 0xa37   : > { %v1429_v42 = vmul.f32 %v2109_v40, %v1427_v41 }
 0xa39   : > { %1431 = vrot.lane.b32.xlu1 %v1429_v42, %s2391_s1 }
 0xa3d   : > { %1360 = vrot.lane.b32.xlu1 %v1359_v44, %s2393_s26 }
 0xa41   : > { %1450 = vrot.lane.b32.xlu1 %v1449_v46, %s2393_s26 }
 0xa45   : > { %1495 = vperm.xlu1 %2046, %v1492_v47  }
 0xaa7   : > { %v1342_v48 = vpop.permute.xlu0 %1341 }
 0xaa8   : > { %v1344_v50 = vadd.f32 %v1342_v48, %v1276_v28 }
 0xaaa   : > { %2110 = vtanh.f32 %v1344_v50 }
 0xaab   : > { %v1432_v51 = vpop.permute.xlu1 %1431 }
 0xaac   : > { %v1434_v52 = vadd.f32 %v1432_v51, %v1366_v30 }
 0xaae   : > { %2112 = vtanh.f32 %v1434_v52 }
 0xaaf   : > { %v1361_v38 = vpop.permute.xlu1 %1360 }
 0xab0   : > { %v1363_v61 = vmul.f32 %v2107_v6, %v1361_v38 }
 0xab3   : > { %v1451_v4 = vpop.permute.xlu1 %1450 }
 0xab4   : > { %v2111_v55 = vpop.eup %2110  ;;  %v1453_v0 = vmul.f32 %v2109_v40, %v1451_v4 }
 0xab5   : > { %1348 = vrot.lane.b32.xlu0 %v2111_v55, %s2394_s20 }
 0xab8   : > { %v2113_v57 = vpop.eup %2112 }
 0xab9   : > { %1438 = vrot.lane.b32.xlu0 %v2113_v57, %s2394_s20 }
 0xabd   : > { %2058 = vperm.xlu0 %2040, %v2057_v33  }
 0xac1   : > { %1503 = vperm.xlu0 %2040, %v1500_v1  }
 0xac4   : > { %v1496_v53 = vpop.permute.xlu1 %1495 }
 0xac5   : > { %v1498_v18 = vmul.f32 %v1496_v53, %v2938_v8 }
 0xb27   : > { %v1349_v60 = vpop.permute.xlu0 %1348 }
 0xb28   : > { %v1351_v62 = vmul.f32 %v1349_v60, %v1346_v59 }
 0xb2a   : > { %v1364_v3 = vadd.f32 %v1363_v61, %v1351_v62 }
 0xb2b   : > { %v1439_v63 = vpop.permute.xlu0 %1438 }
 0xb2c   : > { %v1441_v9 = vmul.f32 %v1439_v63, %v1436_v49  ;;  %v1467_v2 = vrot.slane %v1364_v3, %v2782_v17 }
 0xb2e   : > { %v1454_v5 = vadd.f32 %v1453_v0, %v1441_v9  ;;  %1468 = vrot.lane.b32.xlu1 %v1467_v2, %s2394_s20 }
 0xb30   : > { %v1486_v10 = vrot.slane %v1454_v5, %v2782_v17 }
 0xb32   : > { %1487 = vrot.lane.b32.xlu0 %v1486_v10, %s2394_s20 }
 0xb3c   : > { %v2059_v11 = vpop.permute.xlu0 %2058 }
 0xb3d   : > { %v2060_v13 = vunpack.i.l.bf16 %v2059_v11  ;;  %v2061_v20 = vunpack.i.h.bf16 %v2059_v11 }
 0xb40   : > { %v1504_v58 = vpop.permute.xlu0 %1503 }
 0xb41   : > { %v1506_v23 = vmul.f32 %v1504_v58, %v2945_v12 }
 0xba0   : > { %v1469_v14 = vpop.permute.xlu1 %1468 }
 0xba1   : > { %v1471_v19 = vmul.f32 %v2060_v13, %v1469_v14 }
 0xba3   : > { %1809 = vst.msk [vmem:[%s2717_s7 + $0x6] sm:$0x3] %vm736_vm5, %v1471_v19  ;;  %v1499_v21 = vadd.f32 %v1498_v18, %v1471_v19  ;;  %1513 = sbr.rel (%p1810_p6) target bundleno = 2988 (0xbac), region = 68 }
 0xba4   : > { %v1488_v22 = vpop.permute.xlu0 %1487 }
 0xba5   : > { %1508 = vst.msk [vmem:[#allocation2] sm:$0x3] %vm736_vm5, %v1499_v21  ;;  %v1490_v17 = vmul.f32 %v2061_v20, %v1488_v22 }
 0xba7   : > { %1491 = vst.msk [vmem:[%s2719_s22] sm:$0x3] %vm736_vm5, %v1490_v17  ;;  %v1507_v24 = vadd.f32 %v1506_v23, %v1490_v17 }
 0xba9   : > { %1509 = vst.msk [vmem:[#allocation3] sm:$0x3] %vm736_vm5, %v1507_v24  ;;  %v1514_v8 = vadd.f32 (!%p1810_p6), %v1507_v24, %v1499_v21 }
 0xbab   : > { %1515 = vst.msk [vmem:[#allocation13] sm:$0x3] %vm736_vm5, %v1514_v8 }
 0xbac PF: > { %s1824_s25 = sshll.u32 %s500_s27, 7  ;;  %s1554_s1 = sshll.u32 %s2719_s22, 4  ;;  %s2997_s1 = int_to_ptr.vmem [resolvable:$true] %s1554_s1 }
 0xbad   : > { %s2995_s20 = scalar_lea.hbm %s3132_s8, %s1824_s25  ;;  %s3001_s12 = scalar_lea.sflag [#allocation12], %s401_s24 }
 0xbae   : > { %s2202_s9 = scalar_lea.vmem %s2997_s1, 128  ;;  %s2395_s27 = smov [#allocation11]  }
 0xbaf   : > { %p2203_p0 = scmp.ne.s32.totalorder %s2997_s1, %s2202_s9  ;;  %s2206_s22 = sshll.u32 %s2395_s27, 4  ;;  %s2207_s22 = int_to_ptr.vmem [resolvable:$false] %s2206_s22 }
 0xbb0   : > { %s2208_s21 = scalar_lea.vmem %s2207_s22, 256  ;;  %p2209_p3 = scmp.lt.s32.totalorder %s2997_s1, %s2207_s22 }
 0xbb1   : > { %p2204_p2 = pnand %p2203_p0, %p2641_p8  ;;  %p2210_p4 = scmp.lt.s32.totalorder %s2208_s21, %s2202_s9 }
 0xbb3   : > { %p2205_p12 = pneg %p2204_p2  ;;  %p2211_p13 = por %p2210_p4, %p2209_p3 }
 0xbb5   : > { %p2212_p7 = pnand %p2211_p13, %p2205_p12 }
 0xbb7   : > { %2215 = shalt.err (!%p2212_p7)
}
 0xbb8   : > { %s2216_s24 = scalar_lea.hbm %s2995_s20, 128  ;;  %s2220_s29 = scalar_lea.hbm %s3132_s8, 256 }
 0xbb9   : > { %p2217_p9 = scmp.ne.s32.totalorder %s2995_s20, %s2216_s24  ;;  %p2221_p5 = scmp.lt.u32.totalorder %s2995_s20, %s3132_s8 }
 0xbba   : > { %p2222_p10 = scmp.lt.u32.totalorder %s2220_s29, %s2216_s24  ;;  %p2224_p0 = scmp.lt.u32.totalorder %s2216_s24, %s2995_s20 }
 0xbbb   : > { %p2218_p11 = pnand %p2217_p9, %p2641_p8 }
 0xbbc   : > { %p2223_p6 = por %p2222_p10, %p2221_p5 }
 0xbbd   : > { %p2219_p1 = pneg %p2218_p11 }
 0xbbe   : > { %p2225_p2 = por %p2224_p0, %p2223_p6 }
 0xbc0   : > { %p2226_p12 = pnand %p2225_p2, %p2219_p1 }
 0xbc2   : > { %2229 = shalt.err (!%p2226_p12)
}
 0xbc3   : > { %s2396_s9 = smov 2   ;;  %s3187_s22 = sld [smem:[#allocation24_spill]] }
 0xbc4   : > { %1922 = dma.vmem_to_hbm [thread:$0]  (%p2641_p8), %s2997_s1, 128, %s2995_s20, %s3001_s12, %s2393_s26, %s2393_s26, %s2396_s9  }
 0xbc5   : > { %s1823_s21 = sshll.u32 %s2370_s15, 7  ;;  %s3188_s25 = sld [smem:[#allocation29_spill]] }
 0xbc6   : > { %s1536_s19 = sshll.u32 %s2717_s7, 4  ;;  %s1517_s3 = scalar_lea.sflag [#allocation6], %s2692_s23  ;;  %s3035_s19 = int_to_ptr.vmem [resolvable:$true] %s1536_s19 }
 0xbc7   : > { %s2230_s27 = scalar_lea.vmem %s3035_s19, 128  ;;  %s2397_s0 = smov [#allocation10]  }
 0xbc8   : > { %p2231_p3 = scmp.ne.s32.totalorder %s3035_s19, %s2230_s27  ;;  %s2234_s1 = sshll.u32 %s2397_s0, 4  ;;  %s2235_s1 = int_to_ptr.vmem [resolvable:$false] %s2234_s1 }
 0xbc9   : > { %p3189_p4 = scmp.ne.s32.totalorder %s3187_s22, 0  ;;  %s2236_s15 = scalar_lea.vmem %s2235_s1, 256 }
 0xbca   : > { %p2237_p8 = scmp.lt.s32.totalorder %s3035_s19, %s2235_s1  ;;  %p2238_p9 = scmp.lt.s32.totalorder %s2236_s15, %s2230_s27 }
 0xbcb   : > { %s3032_s29 = scalar_lea.hbm %s3188_s25, %s1823_s21  ;;  %p2232_p13 = pnand %p2231_p3, %p3189_p4 }
 0xbcc   : > { %p2239_p11 = por %p2238_p9, %p2237_p8 }
 0xbcd   : > { %p2233_p7 = pneg %p2232_p13 }
 0xbcf   : > { %p2240_p1 = pnand %p2239_p11, %p2233_p7 }
 0xbd1   : > { %2243 = shalt.err (!%p2240_p1)
}
 0xbd2   : > { %s2244_s7 = scalar_lea.hbm %s3032_s29, 128  ;;  %s2248_s0 = scalar_lea.hbm %s3188_s25, 256 }
 0xbd3   : > { %p2245_p5 = scmp.ne.s32.totalorder %s3032_s29, %s2244_s7  ;;  %p2249_p0 = scmp.lt.u32.totalorder %s3032_s29, %s3188_s25 }
 0xbd4   : > { %p2250_p2 = scmp.lt.u32.totalorder %s2248_s0, %s2244_s7  ;;  %p2252_p3 = scmp.lt.u32.totalorder %s2244_s7, %s3032_s29 }
 0xbd5   : > { %p2246_p10 = pnand %p2245_p5, %p3189_p4 }
 0xbd6   : > { %p2251_p12 = por %p2250_p2, %p2249_p0 }
 0xbd7   : > { %p2247_p6 = pneg %p2246_p10 }
 0xbd8   : > { %p2253_p13 = por %p2252_p3, %p2251_p12 }
 0xbda   : > { %p2254_p7 = pnand %p2253_p13, %p2247_p6 }
 0xbdc   : > { %2257 = shalt.err (!%p2254_p7)
}
 0xbdd   : > { %1921 = dma.vmem_to_hbm [thread:$0]  (%p3189_p4), %s3035_s19, 128, %s3032_s29, %s1517_s3, %s2393_s26, %s2393_s26, %s2396_s9  }
 0xbde   : > { %s2398_s24 = smov [#allocation13]   ;;  %p3190_p9 = scmp.eq.s32.totalorder %s2493_s18, 1 }
 0xbdf   : > { %s1570_s27 = sshll.u32 %s2398_s24, 4  ;;  %s1571_s27 = int_to_ptr.vmem [resolvable:$true] %s1570_s27 }
 0xbe0   : > { %s2258_s1 = scalar_lea.vmem %s1571_s27, 32  ;;  %p2265_p5 = scmp.lt.s32.totalorder %s1571_s27, %s1571_s27 }
 0xbe1   : > { %p2259_p8 = scmp.ne.s32.totalorder %s1571_s27, %s2258_s1  ;;  %p2266_p10 = scmp.lt.s32.totalorder %s2258_s1, %s2258_s1 }
 0xbe3   : > { %p2260_p11 = pnand %p2259_p8, %p3190_p9  ;;  %p2267_p6 = por %p2266_p10, %p2265_p5 }
 0xbe5   : > { %p2261_p1 = pneg %p2260_p11 }
 0xbe7   : > { %p2268_p0 = pnand %p2267_p6, %p2261_p1 }
 0xbe9   : > { %2271 = shalt.err (!%p2268_p0)
}
 0xbea   : > { %s3191_s23 = sld [smem:[#allocation30_spill]]  ;;  %p3192_p2 = pmov %p3190_p9 }
 0xbf0   : > { %s2272_s7 = scalar_lea.hbm %s3191_s23, 32 }
 0xbf1   : > { %p2273_p4 = scmp.ne.s32.totalorder %s3191_s23, %s2272_s7  ;;  %p2278_p13 = scmp.lt.u32.totalorder %s2272_s7, %s3191_s23 }
 0xbf3   : > { %p2274_p12 = pnand %p2273_p4, %p3192_p2 }
 0xbf5   : > { %p2275_p3 = pneg %p2274_p12 }
 0xbf7   : > { %p2280_p7 = pnand %p2278_p13, %p2275_p3 }
 0xbf9   : > { %2283 = shalt.err (!%p2280_p7)
}
 0xbfa   : > { %p3193_p8 = pmov %p3192_p2  ;;  %p3194_p9 = pmov %p3192_p2 }
 0xbfc   : > { %1924 = dma.vmem_to_hbm [thread:$0]  (%p3193_p8), %s1571_s27, 32, %s3191_s23, [#allocation12]  }
 0xbfd   : > { %2333 = dma.done.wait (%p3194_p9), [#allocation12], 32   ;;  %p3195_p11 = pmov %p3192_p2 }
 0xbff   : > { %2335 = vsyncadd (%p3195_p11), [#allocation12], 4294967264 }
 0xc00 PF: > { %s3196_s12 = sld [smem:[#allocation20_spill]]  ;;  %s3197_s0 = sld [smem:[#allocation22_spill]] }
 0xc01   : > { %p3199_p5 = scmp.ge.s32.totalorder %s2378_s17, 2 }
 0xc06   : > { %s1586_s21 = sand.u32 1, %s3196_s12   ;;  %p3198_p1 = scmp.ne.s32.totalorder %s3197_s0, 0 }
 0xc07   : > { %s1587_s30 = scalar_lea.sflag [#allocation6], %s1586_s21 }
 0xc08   : > { %p1941_p10 = pnand %p3199_p5, %p3198_p1 }
 0xc0a   : > { %2337 = dma.done.wait (!%p1941_p10), %s1587_s30, 128  }
 0xc0b   : > { %2339 = vsyncadd (!%p1941_p10), %s1587_s30, 4294967168  ;;  %s3200_s24 = sadd.s32 4294967294, %s2378_s17   ;;  %s3201_s1 = sld [smem:[#allocation23_spill]] }
 0xc0c   : > { %s1595_s27 = sand.u32 1, %s3200_s24   ;;  %p3203_p0 = pmov %p3199_p5 }
 0xc0d   : > { %s1596_s18 = scalar_lea.sflag [#allocation12], %s1595_s27 }
 0xc11   : > { %p3202_p6 = scmp.ne.s32.totalorder %s3201_s1, 0 }
 0xc13   : > { %p1944_p4 = pnand %p3203_p0, %p3202_p6 }
 0xc15   : > { %2341 = dma.done.wait (!%p1944_p4), %s1596_s18, 128  }
 0xc16   : > { %2343 = vsyncadd (!%p1944_p4), %s1596_s18, 4294967168  ;;  %s32_s17 = sadd.s32 1, %s2378_s17   ;;  %s3204_s22 = sld [smem:[#allocation21_spill]] }
 0xc17   : > { %p29_p2 = scmp.ge.s32.totalorder %s32_s17, 4   ;;  %s3205_s15 = sld [smem:[#allocation25_spill]] }
 0xc18   : > { %s3206_s30 = smov %s2350_s10  ;;  %s3207_s10 = smov %s2354_s11 }
 0xc19   : > { %s3208_s11 = smov %s2635_s14  ;;  %s3209_s12 = smov %s2362_s13 }
 0xc1a   :  { %31 = sbr.rel (!%p29_p2) target bundleno = 18 (0x12), region = 159 }
 0xc1c   : > { %s3210_s13 = smov %s3204_s22 }
 0xc1d   : > { %s3211_s14 = smov %s3205_s15  ;;  %s3212_s15 = smov %s2374_s16 }
 0xc1e   : > { %s3213_s16 = smov %s3215_s28 }
 0xc21   :  { %1601 = vsyncpa [#allocation5], 1 }
 0xc22   :  { %1603 = vsyncpa [#allocation5 + $0x1], 1 }
 0xc23   :  { %1604 = vsyncpa [#allocation8], 1 }
 0xc24   :  { %1606 = vsyncpa [#allocation8 + $0x1], 1 }
 0xc25   :  { %1607 = vsyncpa [#allocation6], 1 }
 0xc26   :  { %1609 = vsyncpa [#allocation6 + $0x1], 1 }
 0xc27   :  { %1610 = vsyncpa [#allocation12], 1 }
 0xc28   :  { %1612 = vsyncpa [#allocation12 + $0x1], 1 }

</bundles_post_ra>
